<compile_context>
chip_gen: v5e
topology: v5e:2x2
jax: 0.10.0
libtpu: 0.0.40
codegen_flags: <defaults>
</compile_context>

<pallas_src>
import functools
import math

import jax
import jax.numpy as jnp
from jax.experimental import pallas as pl
from jax.experimental.pallas import tpu as pltpu


def _ceil_div(a, b):
    return -(-a // b)


def _round_up(a, b):
    return _ceil_div(a, b) * b


def _vmem_cap_bytes():
    """Generation-aware VMEM budget (~60% of physical; fallback assumes 64 MiB/TC)."""
    try:
        phys = int(pltpu.get_tpu_info().vmem_capacity_bytes)
    except Exception:
        phys = 64 << 20
    return max(16 << 20, int(phys * 0.6))


def _vmem_limit_bytes(need_bytes, cap):
    return int(min(cap, max(16 << 20, need_bytes + (2 << 20))))


# ----------------------------- kernels --------------------------------------


def _stats_kernel(x_ref, stats_ref, *, n_blades):
    """Single-pass shifted first/second moments, entirely on the VPU.

    x_ref:     (I, bn, tile_m)  original dtype, cast to f32 on load.
    stats_ref: (K, bn, 1) f32,  K = 2*I + I*(I+1)//2, resident across m tiles:
        rows [0, I)   : mu0     (shift = first-tile mean, also an output)
        rows [I, 2I)  : sum_m (x - mu0)
        rows [2I, K)  : sum_m (x_i - mu0_i)(x_j - mu0_j) for pairs i <= j
    """
    I = n_blades
    n_pairs = (I * (I + 1)) // 2
    K = 2 * I + n_pairs
    m = pl.program_id(1)

    xs = [x_ref[i].astype(jnp.float32) for i in range(I)]  # each (bn, tile_m)

    @pl.when(m == 0)
    def _():
        zero = jnp.zeros(stats_ref.shape[1:], jnp.float32)
        for i in range(I):
            stats_ref[i] = jnp.mean(xs[i], axis=-1, keepdims=True)
        for r in range(I, K):
            stats_ref[r] = zero

    # center by the per-row shift (lane broadcast of a (bn, 1) column)
    xc = [xs[i] - stats_ref[i] for i in range(I)]

    for i in range(I):
        stats_ref[I + i] += jnp.sum(xc[i], axis=-1, keepdims=True)

    r = 2 * I
    for i in range(I):
        for j in range(i, I):
            stats_ref[r] += jnp.sum(xc[i] * xc[j], axis=-1, keepdims=True)
            r += 1


def _apply_kernel(c_ref, x_ref, o_ref, *, n_blades):
    """y[i] = sum_j A[i, j] * x[j] + shift[i], block-diagonal A applied on the VPU.

    c_ref: (I*I + I, bn, 1) f32: row i*I+j holds A[i, j], row I*I+i holds shift[i].
    x_ref / o_ref: (I, bn, tile_m), original dtype.
    """
    I = n_blades
    xs = [x_ref[j].astype(jnp.float32) for j in range(I)]
    for i in range(I):
        y = c_ref[I * I + i] + c_ref[i * I] * xs[0]
        for j in range(1, I):
            y = y + c_ref[i * I + j] * xs[j]
        o_ref[i] = y.astype(o_ref.dtype)


# ----------------------------- wrapper ---------------------------------------


def clifford_group_norm_pallas(x, weight, bias, num_groups, eps=1e-5,
                               max_tile_m=1024, block_bytes=4 * 1024 * 1024):
    """x: (B, C, *D, I); weight: (I, I, C//num_groups); bias: (I, C//num_groups)."""
    orig_dtype = x.dtype
    B, C = x.shape[0], x.shape[1]
    I = x.shape[-1]
    D = x.shape[2:-1]
    G = num_groups
    assert C % G == 0
    CG = C // G                       # weight / bias channel dim
    NG = B * CG                       # independent normalization instances
    M = G * math.prod(D)              # reduced positions per instance
    itemsize = jnp.dtype(orig_dtype).itemsize
    n_pairs = (I * (I + 1)) // 2
    K = 2 * I + n_pairs

    # ---- static tiling parameters ----
    vmem_cap = _vmem_cap_bytes()
    # apply kernel double-buffers input + output blocks -> ~4x block_bytes
    block_bytes = max(64 * 1024, min(block_bytes, (vmem_cap - (4 << 20)) // 5))

    n_m_tiles = max(1, _ceil_div(M, max_tile_m))
    tile_m = _round_up(_ceil_div(M, n_m_tiles), 128)
    Mp = n_m_tiles * tile_m
    pad_m = Mp - M

    bn_cap = max(8, (block_bytes // (I * tile_m * itemsize)) // 8 * 8)
    bn = min(bn_cap, _round_up(NG, 8))
    n_ng_blocks = _ceil_div(NG, bn)
    NGp = n_ng_blocks * bn

    # ---- layout: (B, C, *D, I) -> (NG, M, I) -> (I, NG, M) -> padded ----
    # The group split is a pure reshape (instance index = b*CG + c//G); only
    # the blade axis needs to move, done by XLA in one fused transpose+pad.
    x_k = jnp.transpose(x.reshape(NG, M, I), (2, 0, 1))
    x_p = jnp.pad(x_k, ((0, 0), (0, NGp - NG), (0, pad_m)))    # (I, NGp, Mp)

    in_block = I * bn * tile_m * itemsize
    out_block = I * bn * tile_m * itemsize
    stats_block = K * bn * 4
    coef_block = (I * I + I) * bn * 4

    # ---- kernel 1: stats (HBM-bound VPU reduction) ----
    stats = pl.pallas_call(
        functools.partial(_stats_kernel, n_blades=I),
        out_shape=jax.ShapeDtypeStruct((K, NGp, 1), jnp.float32),
        grid_spec=pltpu.PrefetchScalarGridSpec(
            num_scalar_prefetch=0,
            grid=(n_ng_blocks, n_m_tiles),
            in_specs=[pl.BlockSpec((I, bn, tile_m), lambda g, m: (0, g, m))],
            out_specs=pl.BlockSpec((K, bn, 1), lambda g, m: (0, g, 0)),
        ),
        compiler_params=pltpu.CompilerParams(
            dimension_semantics=("parallel", "arbitrary"),
            vmem_limit_bytes=_vmem_limit_bytes(2 * in_block + stats_block, vmem_cap)),
        cost_estimate=pl.CostEstimate(
            flops=NGp * Mp * I * (I + 3),
            transcendentals=0,
            bytes_accessed=I * NGp * Mp * itemsize + K * NGp * 4),
    )(x_p)

    # ---- plain-JAX glue: tiny per-instance I x I linear algebra ----
    stats = stats[..., 0]                     # (K, NGp)
    mu0 = jnp.transpose(stats[:I])            # (NGp, I)
    s = jnp.transpose(stats[I:2 * I])         # (NGp, I)
    qp = jnp.transpose(stats[2 * I:])         # (NGp, n_pairs)

    # rebuild the symmetric second moment
    q = jnp.zeros((NGp, I, I), jnp.float32)
    k = 0
    for i in range(I):
        for j in range(i, I):
            q = q.at[:, i, j].set(qp[:, k])
            if i != j:
                q = q.at[:, j, i].set(qp[:, k])
            k += 1

    # undo the contribution of the zero-padded M tail (raw 0 -> centered -mu0)
    if pad_m:
        s = s + pad_m * mu0
        q = q - pad_m * (mu0[:, :, None] * mu0[:, None, :])

    sbar = s / M
    mean = mu0 + sbar                                            # (NGp, I)
    cov = q / M - sbar[:, :, None] * sbar[:, None, :]            # (NGp, I, I)
    cov = cov + eps * jnp.eye(I, dtype=jnp.float32)[None]
    L = jnp.linalg.cholesky(cov)
    U = jnp.swapaxes(L, -1, -2)
    eye_b = jnp.broadcast_to(jnp.eye(I, dtype=jnp.float32), (NGp, I, I))
    u_inv = jax.scipy.linalg.solve_triangular(U, eye_b, lower=False)

    # fold affine weight/bias (indexed by q_idx = instance % CG) into y = A x + shift
    q_idx = jnp.arange(NGp) % CG
    w_i = jnp.transpose(weight, (2, 0, 1)).astype(jnp.float32)[q_idx]    # (NGp, I, I)
    b_i = jnp.transpose(bias, (1, 0)).astype(jnp.float32)[q_idx]         # (NGp, I)
    A = jnp.einsum('nij,njk->nik', w_i, u_inv)
    shift = b_i - jnp.einsum('nij,nj->ni', A, mean)

    coef = jnp.concatenate([A.reshape(NGp, I * I), shift], axis=1)       # (NGp, I*I+I)
    coef = jnp.transpose(coef, (1, 0))[:, :, None]                       # (I*I+I, NGp, 1)

    # ---- kernel 2: y = A x + shift over the whole tensor (VPU, orig dtype out) ----
    y_p = pl.pallas_call(
        functools.partial(_apply_kernel, n_blades=I),
        out_shape=jax.ShapeDtypeStruct((I, NGp, Mp), orig_dtype),
        grid_spec=pltpu.PrefetchScalarGridSpec(
            num_scalar_prefetch=0,
            grid=(n_ng_blocks, n_m_tiles),
            in_specs=[pl.BlockSpec((I * I + I, bn, 1), lambda g, m: (0, g, 0)),
                      pl.BlockSpec((I, bn, tile_m), lambda g, m: (0, g, m))],
            out_specs=pl.BlockSpec((I, bn, tile_m), lambda g, m: (0, g, m)),
        ),
        compiler_params=pltpu.CompilerParams(
            dimension_semantics=("parallel", "parallel"),
            vmem_limit_bytes=_vmem_limit_bytes(
                2 * (in_block + out_block) + coef_block, vmem_cap)),
        cost_estimate=pl.CostEstimate(
            flops=NGp * Mp * I * (2 * I + 1),
            transcendentals=0,
            bytes_accessed=2 * I * NGp * Mp * itemsize + (I * I + I) * NGp * 4),
    )(coef, x_p)

    # ---- back to (B, C, *D, I) ----
    y = jnp.transpose(y_p[:, :NG, :M], (1, 2, 0)).reshape(x.shape)
    return y


# ----------------------------- reference -------------------------------------


def clifford_group_norm_ref(x, weight, bias, num_groups, eps=1e-5):
    """Pure-JAX mirror of the PyTorch _CliffordGroupNorm forward."""
    B, C = x.shape[0], x.shape[1]
    I = x.shape[-1]
    D = x.shape[2:-1]
    G = num_groups
    CG = C // G
    NG = B * CG
    M = G * math.prod(D)
    xr = x.reshape(NG, M, I).astype(jnp.float32)
    mean = jnp.mean(xr, axis=1)                              # (NG, I)
    xc = xr - mean[:, None, :]
    X = jnp.swapaxes(xc, 1, 2)                               # (NG, I, M)
    cov = X @ jnp.swapaxes(X, 1, 2) / M
    cov = cov + eps * jnp.eye(I, dtype=jnp.float32)[None]
    L = jnp.linalg.cholesky(cov)
    U = jnp.swapaxes(L, 1, 2)
    eye_b = jnp.broadcast_to(jnp.eye(I, dtype=jnp.float32), (NG, I, I))
    u_inv = jax.scipy.linalg.solve_triangular(U, eye_b, lower=False)
    xw = jnp.einsum('nij,nmj->nmi', u_inv, xc)
    q_idx = jnp.arange(NG) % CG
    w_n = jnp.transpose(weight, (2, 0, 1)).astype(jnp.float32)[q_idx]
    b_n = jnp.transpose(bias, (1, 0)).astype(jnp.float32)[q_idx]
    y = jnp.einsum('nij,nmj->nmi', w_n, xw) + b_n[:, None, :]
    return y.reshape(x.shape)


if __name__ == "__main__":
    key = jax.random.PRNGKey(0)
    k1, k2, k3, k4, k5, k6 = jax.random.split(key, 6)

    # --- test 1: g = (1, 1) -> n_blades I = 4; aligned M, NG padded 4 -> 8 ---
    B, C, H, W, I = 2, 4, 16, 16, 4
    G = 2
    CG = C // G
    x = jax.random.normal(k1, (B, C, H, W, I), dtype=jnp.float32)
    # module __init__ sets weight = eye (per group channel), bias = 0; perturb
    # deterministically so the affine path is actually exercised.
    weight = (jnp.tile(jnp.eye(I, dtype=jnp.float32)[:, :, None], (1, 1, CG))
              + 0.1 * jax.random.normal(k2, (I, I, CG), dtype=jnp.float32))
    bias = 0.1 * jax.random.normal(k3, (I, CG), dtype=jnp.float32)

    fn = jax.jit(functools.partial(clifford_group_norm_pallas,
                                   num_groups=G, eps=1e-5))
    y = jax.block_until_ready(fn(x, weight, bias))
    y_ref = clifford_group_norm_ref(x, weight, bias, G, eps=1e-5)
    assert y.shape == (B, C, H, W, I)
    assert jnp.allclose(y, y_ref, atol=2e-3, rtol=2e-3), "mismatch vs reference (test 1)"

    # --- test 2: g = (1,) -> I = 2; odd sizes exercise the M / NG padding path ---
    B2, C2, H2, W2, I2 = 2, 6, 7, 5, 2
    G2 = 3
    CG2 = C2 // G2
    x2 = jax.random.normal(k4, (B2, C2, H2, W2, I2), dtype=jnp.float32)
    weight2 = (jnp.tile(jnp.eye(I2, dtype=jnp.float32)[:, :, None], (1, 1, CG2))
               + 0.1 * jax.random.normal(k5, (I2, I2, CG2), dtype=jnp.float32))
    bias2 = 0.1 * jax.random.normal(k6, (I2, CG2), dtype=jnp.float32)

    fn2 = jax.jit(functools.partial(clifford_group_norm_pallas,
                                    num_groups=G2, eps=1e-5))
    y2 = jax.block_until_ready(fn2(x2, weight2, bias2))
    y2_ref = clifford_group_norm_ref(x2, weight2, bias2, G2, eps=1e-5)
    assert y2.shape == (B2, C2, H2, W2, I2)
    assert jnp.allclose(y2, y2_ref, atol=2e-3, rtol=2e-3), "mismatch vs reference (test 2)"

    print("KERNEL_OK")
</pallas_src>

<mosaic_0001>
module attributes {stable_mosaic.version = 11 : i64} {
  func.func @_stats_kernel(%arg0: i32, %arg1: i32, %arg2: memref<4x8x512xf32, #tpu.memory_space<vmem>>, %arg3: memref<18x8x1xf32, #tpu.memory_space<vmem>>) attributes {dimension_semantics = [#tpu.dimension_semantics<parallel>, #tpu.dimension_semantics<arbitrary>], iteration_bounds = array<i64: 1, 1>, scalar_prefetch = 0 : i64, scratch_operands = 0 : i64, tpu.core_type = #tpu.core_type<tc>, window_params = [{transform_indices = @transform_0, window_bounds = array<i64: 4, 8, 512>}, {transform_indices = @transform_1, window_bounds = array<i64: 18, 8, 1>}]} {
    %c0 = arith.constant 0 : index
    %c0_0 = arith.constant 0 : index
    %c0_1 = arith.constant 0 : index
    %0 = vector.load %arg2[%c0, %c0_0, %c0_1] : memref<4x8x512xf32, #tpu.memory_space<vmem>>, vector<1x8x512xf32>
    %1 = vector.shape_cast %0 : vector<1x8x512xf32> to vector<8x512xf32>
    %c1 = arith.constant 1 : index
    %c0_2 = arith.constant 0 : index
    %c0_3 = arith.constant 0 : index
    %2 = vector.load %arg2[%c1, %c0_2, %c0_3] : memref<4x8x512xf32, #tpu.memory_space<vmem>>, vector<1x8x512xf32>
    %3 = vector.shape_cast %2 : vector<1x8x512xf32> to vector<8x512xf32>
    %c2 = arith.constant 2 : index
    %c0_4 = arith.constant 0 : index
    %c0_5 = arith.constant 0 : index
    %4 = vector.load %arg2[%c2, %c0_4, %c0_5] : memref<4x8x512xf32, #tpu.memory_space<vmem>>, vector<1x8x512xf32>
    %5 = vector.shape_cast %4 : vector<1x8x512xf32> to vector<8x512xf32>
    %c3 = arith.constant 3 : index
    %c0_6 = arith.constant 0 : index
    %c0_7 = arith.constant 0 : index
    %6 = vector.load %arg2[%c3, %c0_6, %c0_7] : memref<4x8x512xf32, #tpu.memory_space<vmem>>, vector<1x8x512xf32>
    %7 = vector.shape_cast %6 : vector<1x8x512xf32> to vector<8x512xf32>
    %c0_i32 = arith.constant 0 : i32
    %8 = arith.cmpi eq, %arg1, %c0_i32 : i32
    %9 = arith.extui %8 : i1 to i32
    %c0_i32_8 = arith.constant 0 : i32
    %10 = arith.cmpi ne, %9, %c0_i32_8 : i32
    scf.if %10 {
      %cst_104 = arith.constant 0.000000e+00 : f32
      %149 = vector.broadcast %cst_104 : f32 to vector<8x1xf32>
      %cst_105 = arith.constant dense<0.000000e+00> : vector<8xf32>
      %150 = vector.multi_reduction <add>, %1, %cst_105 [1] : vector<8x512xf32> to vector<8xf32>
      %151 = vector.shape_cast %150 : vector<8xf32> to vector<8x1xf32>
      %cst_106 = arith.constant 5.120000e+02 : f32
      %152 = vector.broadcast %cst_106 : f32 to vector<8x1xf32>
      %153 = arith.divf %151, %152 : vector<8x1xf32>
      %c0_107 = arith.constant 0 : index
      %c0_108 = arith.constant 0 : index
      %c0_109 = arith.constant 0 : index
      %154 = vector.load %arg3[%c0_107, %c0_108, %c0_109] : memref<18x8x1xf32, #tpu.memory_space<vmem>>, vector<1x8x1xf32>
      %155 = vector.shape_cast %154 : vector<1x8x1xf32> to vector<8x1xf32>
      %156 = vector.shape_cast %153 : vector<8x1xf32> to vector<1x8x1xf32>
      tpu.vector_store %arg3[%c0_107, %c0_108, %c0_109], %156 {strides = array<i32>} : memref<18x8x1xf32, #tpu.memory_space<vmem>>, vector<1x8x1xf32>,
      %cst_110 = arith.constant dense<0.000000e+00> : vector<8xf32>
      %157 = vector.multi_reduction <add>, %3, %cst_110 [1] : vector<8x512xf32> to vector<8xf32>
      %158 = vector.shape_cast %157 : vector<8xf32> to vector<8x1xf32>
      %cst_111 = arith.constant 5.120000e+02 : f32
      %159 = vector.broadcast %cst_111 : f32 to vector<8x1xf32>
      %160 = arith.divf %158, %159 : vector<8x1xf32>
      %c1_112 = arith.constant 1 : index
      %c0_113 = arith.constant 0 : index
      %c0_114 = arith.constant 0 : index
      %161 = vector.load %arg3[%c1_112, %c0_113, %c0_114] : memref<18x8x1xf32, #tpu.memory_space<vmem>>, vector<1x8x1xf32>
      %162 = vector.shape_cast %161 : vector<1x8x1xf32> to vector<8x1xf32>
      %163 = vector.shape_cast %160 : vector<8x1xf32> to vector<1x8x1xf32>
      tpu.vector_store %arg3[%c1_112, %c0_113, %c0_114], %163 {strides = array<i32>} : memref<18x8x1xf32, #tpu.memory_space<vmem>>, vector<1x8x1xf32>,
      %cst_115 = arith.constant dense<0.000000e+00> : vector<8xf32>
      %164 = vector.multi_reduction <add>, %5, %cst_115 [1] : vector<8x512xf32> to vector<8xf32>
      %165 = vector.shape_cast %164 : vector<8xf32> to vector<8x1xf32>
      %cst_116 = arith.constant 5.120000e+02 : f32
      %166 = vector.broadcast %cst_116 : f32 to vector<8x1xf32>
      %167 = arith.divf %165, %166 : vector<8x1xf32>
      %c2_117 = arith.constant 2 : index
      %c0_118 = arith.constant 0 : index
      %c0_119 = arith.constant 0 : index
      %168 = vector.load %arg3[%c2_117, %c0_118, %c0_119] : memref<18x8x1xf32, #tpu.memory_space<vmem>>, vector<1x8x1xf32>
      %169 = vector.shape_cast %168 : vector<1x8x1xf32> to vector<8x1xf32>
      %170 = vector.shape_cast %167 : vector<8x1xf32> to vector<1x8x1xf32>
      tpu.vector_store %arg3[%c2_117, %c0_118, %c0_119], %170 {strides = array<i32>} : memref<18x8x1xf32, #tpu.memory_space<vmem>>, vector<1x8x1xf32>,
      %cst_120 = arith.constant dense<0.000000e+00> : vector<8xf32>
      %171 = vector.multi_reduction <add>, %7, %cst_120 [1] : vector<8x512xf32> to vector<8xf32>
      %172 = vector.shape_cast %171 : vector<8xf32> to vector<8x1xf32>
      %cst_121 = arith.constant 5.120000e+02 : f32
      %173 = vector.broadcast %cst_121 : f32 to vector<8x1xf32>
      %174 = arith.divf %172, %173 : vector<8x1xf32>
      %c3_122 = arith.constant 3 : index
      %c0_123 = arith.constant 0 : index
      %c0_124 = arith.constant 0 : index
      %175 = vector.load %arg3[%c3_122, %c0_123, %c0_124] : memref<18x8x1xf32, #tpu.memory_space<vmem>>, vector<1x8x1xf32>
      %176 = vector.shape_cast %175 : vector<1x8x1xf32> to vector<8x1xf32>
      %177 = vector.shape_cast %174 : vector<8x1xf32> to vector<1x8x1xf32>
      tpu.vector_store %arg3[%c3_122, %c0_123, %c0_124], %177 {strides = array<i32>} : memref<18x8x1xf32, #tpu.memory_space<vmem>>, vector<1x8x1xf32>,
      %c4_125 = arith.constant 4 : index
      %c0_126 = arith.constant 0 : index
      %c0_127 = arith.constant 0 : index
      %178 = vector.load %arg3[%c4_125, %c0_126, %c0_127] : memref<18x8x1xf32, #tpu.memory_space<vmem>>, vector<1x8x1xf32>
      %179 = vector.shape_cast %178 : vector<1x8x1xf32> to vector<8x1xf32>
      %180 = vector.shape_cast %149 : vector<8x1xf32> to vector<1x8x1xf32>
      tpu.vector_store %arg3[%c4_125, %c0_126, %c0_127], %180 {strides = array<i32>} : memref<18x8x1xf32, #tpu.memory_space<vmem>>, vector<1x8x1xf32>,
      %c5_128 = arith.constant 5 : index
      %c0_129 = arith.constant 0 : index
      %c0_130 = arith.constant 0 : index
      %181 = vector.load %arg3[%c5_128, %c0_129, %c0_130] : memref<18x8x1xf32, #tpu.memory_space<vmem>>, vector<1x8x1xf32>
      %182 = vector.shape_cast %181 : vector<1x8x1xf32> to vector<8x1xf32>
      %183 = vector.shape_cast %149 : vector<8x1xf32> to vector<1x8x1xf32>
      tpu.vector_store %arg3[%c5_128, %c0_129, %c0_130], %183 {strides = array<i32>} : memref<18x8x1xf32, #tpu.memory_space<vmem>>, vector<1x8x1xf32>,
      %c6_131 = arith.constant 6 : index
      %c0_132 = arith.constant 0 : index
      %c0_133 = arith.constant 0 : index
      %184 = vector.load %arg3[%c6_131, %c0_132, %c0_133] : memref<18x8x1xf32, #tpu.memory_space<vmem>>, vector<1x8x1xf32>
      %185 = vector.shape_cast %184 : vector<1x8x1xf32> to vector<8x1xf32>
      %186 = vector.shape_cast %149 : vector<8x1xf32> to vector<1x8x1xf32>
      tpu.vector_store %arg3[%c6_131, %c0_132, %c0_133], %186 {strides = array<i32>} : memref<18x8x1xf32, #tpu.memory_space<vmem>>, vector<1x8x1xf32>,
      %c7_134 = arith.constant 7 : index
      %c0_135 = arith.constant 0 : index
      %c0_136 = arith.constant 0 : index
      %187 = vector.load %arg3[%c7_134, %c0_135, %c0_136] : memref<18x8x1xf32, #tpu.memory_space<vmem>>, vector<1x8x1xf32>
      %188 = vector.shape_cast %187 : vector<1x8x1xf32> to vector<8x1xf32>
      %189 = vector.shape_cast %149 : vector<8x1xf32> to vector<1x8x1xf32>
      tpu.vector_store %arg3[%c7_134, %c0_135, %c0_136], %189 {strides = array<i32>} : memref<18x8x1xf32, #tpu.memory_space<vmem>>, vector<1x8x1xf32>,
      %c8_137 = arith.constant 8 : index
      %c0_138 = arith.constant 0 : index
      %c0_139 = arith.constant 0 : index
      %190 = vector.load %arg3[%c8_137, %c0_138, %c0_139] : memref<18x8x1xf32, #tpu.memory_space<vmem>>, vector<1x8x1xf32>
      %191 = vector.shape_cast %190 : vector<1x8x1xf32> to vector<8x1xf32>
      %192 = vector.shape_cast %149 : vector<8x1xf32> to vector<1x8x1xf32>
      tpu.vector_store %arg3[%c8_137, %c0_138, %c0_139], %192 {strides = array<i32>} : memref<18x8x1xf32, #tpu.memory_space<vmem>>, vector<1x8x1xf32>,
      %c9_140 = arith.constant 9 : index
      %c0_141 = arith.constant 0 : index
      %c0_142 = arith.constant 0 : index
      %193 = vector.load %arg3[%c9_140, %c0_141, %c0_142] : memref<18x8x1xf32, #tpu.memory_space<vmem>>, vector<1x8x1xf32>
      %194 = vector.shape_cast %193 : vector<1x8x1xf32> to vector<8x1xf32>
      %195 = vector.shape_cast %149 : vector<8x1xf32> to vector<1x8x1xf32>
      tpu.vector_store %arg3[%c9_140, %c0_141, %c0_142], %195 {strides = array<i32>} : memref<18x8x1xf32, #tpu.memory_space<vmem>>, vector<1x8x1xf32>,
      %c10_143 = arith.constant 10 : index
      %c0_144 = arith.constant 0 : index
      %c0_145 = arith.constant 0 : index
      %196 = vector.load %arg3[%c10_143, %c0_144, %c0_145] : memref<18x8x1xf32, #tpu.memory_space<vmem>>, vector<1x8x1xf32>
      %197 = vector.shape_cast %196 : vector<1x8x1xf32> to vector<8x1xf32>
      %198 = vector.shape_cast %149 : vector<8x1xf32> to vector<1x8x1xf32>
      tpu.vector_store %arg3[%c10_143, %c0_144, %c0_145], %198 {strides = array<i32>} : memref<18x8x1xf32, #tpu.memory_space<vmem>>, vector<1x8x1xf32>,
      %c11_146 = arith.constant 11 : index
      %c0_147 = arith.constant 0 : index
      %c0_148 = arith.constant 0 : index
      %199 = vector.load %arg3[%c11_146, %c0_147, %c0_148] : memref<18x8x1xf32, #tpu.memory_space<vmem>>, vector<1x8x1xf32>
      %200 = vector.shape_cast %199 : vector<1x8x1xf32> to vector<8x1xf32>
      %201 = vector.shape_cast %149 : vector<8x1xf32> to vector<1x8x1xf32>
      tpu.vector_store %arg3[%c11_146, %c0_147, %c0_148], %201 {strides = array<i32>} : memref<18x8x1xf32, #tpu.memory_space<vmem>>, vector<1x8x1xf32>,
      %c12_149 = arith.constant 12 : index
      %c0_150 = arith.constant 0 : index
      %c0_151 = arith.constant 0 : index
      %202 = vector.load %arg3[%c12_149, %c0_150, %c0_151] : memref<18x8x1xf32, #tpu.memory_space<vmem>>, vector<1x8x1xf32>
      %203 = vector.shape_cast %202 : vector<1x8x1xf32> to vector<8x1xf32>
      %204 = vector.shape_cast %149 : vector<8x1xf32> to vector<1x8x1xf32>
      tpu.vector_store %arg3[%c12_149, %c0_150, %c0_151], %204 {strides = array<i32>} : memref<18x8x1xf32, #tpu.memory_space<vmem>>, vector<1x8x1xf32>,
      %c13_152 = arith.constant 13 : index
      %c0_153 = arith.constant 0 : index
      %c0_154 = arith.constant 0 : index
      %205 = vector.load %arg3[%c13_152, %c0_153, %c0_154] : memref<18x8x1xf32, #tpu.memory_space<vmem>>, vector<1x8x1xf32>
      %206 = vector.shape_cast %205 : vector<1x8x1xf32> to vector<8x1xf32>
      %207 = vector.shape_cast %149 : vector<8x1xf32> to vector<1x8x1xf32>
      tpu.vector_store %arg3[%c13_152, %c0_153, %c0_154], %207 {strides = array<i32>} : memref<18x8x1xf32, #tpu.memory_space<vmem>>, vector<1x8x1xf32>,
      %c14_155 = arith.constant 14 : index
      %c0_156 = arith.constant 0 : index
      %c0_157 = arith.constant 0 : index
      %208 = vector.load %arg3[%c14_155, %c0_156, %c0_157] : memref<18x8x1xf32, #tpu.memory_space<vmem>>, vector<1x8x1xf32>
      %209 = vector.shape_cast %208 : vector<1x8x1xf32> to vector<8x1xf32>
      %210 = vector.shape_cast %149 : vector<8x1xf32> to vector<1x8x1xf32>
      tpu.vector_store %arg3[%c14_155, %c0_156, %c0_157], %210 {strides = array<i32>} : memref<18x8x1xf32, #tpu.memory_space<vmem>>, vector<1x8x1xf32>,
      %c15_158 = arith.constant 15 : index
      %c0_159 = arith.constant 0 : index
      %c0_160 = arith.constant 0 : index
      %211 = vector.load %arg3[%c15_158, %c0_159, %c0_160] : memref<18x8x1xf32, #tpu.memory_space<vmem>>, vector<1x8x1xf32>
      %212 = vector.shape_cast %211 : vector<1x8x1xf32> to vector<8x1xf32>
      %213 = vector.shape_cast %149 : vector<8x1xf32> to vector<1x8x1xf32>
      tpu.vector_store %arg3[%c15_158, %c0_159, %c0_160], %213 {strides = array<i32>} : memref<18x8x1xf32, #tpu.memory_space<vmem>>, vector<1x8x1xf32>,
      %c16_161 = arith.constant 16 : index
      %c0_162 = arith.constant 0 : index
      %c0_163 = arith.constant 0 : index
      %214 = vector.load %arg3[%c16_161, %c0_162, %c0_163] : memref<18x8x1xf32, #tpu.memory_space<vmem>>, vector<1x8x1xf32>
      %215 = vector.shape_cast %214 : vector<1x8x1xf32> to vector<8x1xf32>
      %216 = vector.shape_cast %149 : vector<8x1xf32> to vector<1x8x1xf32>
      tpu.vector_store %arg3[%c16_161, %c0_162, %c0_163], %216 {strides = array<i32>} : memref<18x8x1xf32, #tpu.memory_space<vmem>>, vector<1x8x1xf32>,
      %c17_164 = arith.constant 17 : index
      %c0_165 = arith.constant 0 : index
      %c0_166 = arith.constant 0 : index
      %217 = vector.load %arg3[%c17_164, %c0_165, %c0_166] : memref<18x8x1xf32, #tpu.memory_space<vmem>>, vector<1x8x1xf32>
      %218 = vector.shape_cast %217 : vector<1x8x1xf32> to vector<8x1xf32>
      %219 = vector.shape_cast %149 : vector<8x1xf32> to vector<1x8x1xf32>
      tpu.vector_store %arg3[%c17_164, %c0_165, %c0_166], %219 {strides = array<i32>} : memref<18x8x1xf32, #tpu.memory_space<vmem>>, vector<1x8x1xf32>,
    } else {
    }
    %c0_9 = arith.constant 0 : index
    %c0_10 = arith.constant 0 : index
    %c0_11 = arith.constant 0 : index
    %11 = vector.load %arg3[%c0_9, %c0_10, %c0_11] : memref<18x8x1xf32, #tpu.memory_space<vmem>>, vector<1x8x1xf32>
    %12 = vector.shape_cast %11 : vector<1x8x1xf32> to vector<8x1xf32>
    %13 = vector.broadcast %12 : vector<8x1xf32> to vector<8x512xf32>
    %14 = arith.subf %1, %13 : vector<8x512xf32>
    %c1_12 = arith.constant 1 : index
    %c0_13 = arith.constant 0 : index
    %c0_14 = arith.constant 0 : index
    %15 = vector.load %arg3[%c1_12, %c0_13, %c0_14] : memref<18x8x1xf32, #tpu.memory_space<vmem>>, vector<1x8x1xf32>
    %16 = vector.shape_cast %15 : vector<1x8x1xf32> to vector<8x1xf32>
    %17 = vector.broadcast %16 : vector<8x1xf32> to vector<8x512xf32>
    %18 = arith.subf %3, %17 : vector<8x512xf32>
    %c2_15 = arith.constant 2 : index
    %c0_16 = arith.constant 0 : index
    %c0_17 = arith.constant 0 : index
    %19 = vector.load %arg3[%c2_15, %c0_16, %c0_17] : memref<18x8x1xf32, #tpu.memory_space<vmem>>, vector<1x8x1xf32>
    %20 = vector.shape_cast %19 : vector<1x8x1xf32> to vector<8x1xf32>
    %21 = vector.broadcast %20 : vector<8x1xf32> to vector<8x512xf32>
    %22 = arith.subf %5, %21 : vector<8x512xf32>
    %c3_18 = arith.constant 3 : index
    %c0_19 = arith.constant 0 : index
    %c0_20 = arith.constant 0 : index
    %23 = vector.load %arg3[%c3_18, %c0_19, %c0_20] : memref<18x8x1xf32, #tpu.memory_space<vmem>>, vector<1x8x1xf32>
    %24 = vector.shape_cast %23 : vector<1x8x1xf32> to vector<8x1xf32>
    %25 = vector.broadcast %24 : vector<8x1xf32> to vector<8x512xf32>
    %26 = arith.subf %7, %25 : vector<8x512xf32>
    %c4 = arith.constant 4 : index
    %c0_21 = arith.constant 0 : index
    %c0_22 = arith.constant 0 : index
    %27 = vector.load %arg3[%c4, %c0_21, %c0_22] : memref<18x8x1xf32, #tpu.memory_space<vmem>>, vector<1x8x1xf32>
    %28 = vector.shape_cast %27 : vector<1x8x1xf32> to vector<8x1xf32>
    %cst = arith.constant dense<0.000000e+00> : vector<8xf32>
    %29 = vector.multi_reduction <add>, %14, %cst [1] : vector<8x512xf32> to vector<8xf32>
    %30 = vector.shape_cast %29 : vector<8xf32> to vector<8x1xf32>
    %31 = arith.addf %28, %30 : vector<8x1xf32>
    %c4_23 = arith.constant 4 : index
    %c0_24 = arith.constant 0 : index
    %c0_25 = arith.constant 0 : index
    %32 = vector.load %arg3[%c4_23, %c0_24, %c0_25] : memref<18x8x1xf32, #tpu.memory_space<vmem>>, vector<1x8x1xf32>
    %33 = vector.shape_cast %32 : vector<1x8x1xf32> to vector<8x1xf32>
    %34 = vector.shape_cast %31 : vector<8x1xf32> to vector<1x8x1xf32>
    tpu.vector_store %arg3[%c4_23, %c0_24, %c0_25], %34 {strides = array<i32>} : memref<18x8x1xf32, #tpu.memory_space<vmem>>, vector<1x8x1xf32>,
    %c5 = arith.constant 5 : index
    %c0_26 = arith.constant 0 : index
    %c0_27 = arith.constant 0 : index
    %35 = vector.load %arg3[%c5, %c0_26, %c0_27] : memref<18x8x1xf32, #tpu.memory_space<vmem>>, vector<1x8x1xf32>
    %36 = vector.shape_cast %35 : vector<1x8x1xf32> to vector<8x1xf32>
    %cst_28 = arith.constant dense<0.000000e+00> : vector<8xf32>
    %37 = vector.multi_reduction <add>, %18, %cst_28 [1] : vector<8x512xf32> to vector<8xf32>
    %38 = vector.shape_cast %37 : vector<8xf32> to vector<8x1xf32>
    %39 = arith.addf %36, %38 : vector<8x1xf32>
    %c5_29 = arith.constant 5 : index
    %c0_30 = arith.constant 0 : index
    %c0_31 = arith.constant 0 : index
    %40 = vector.load %arg3[%c5_29, %c0_30, %c0_31] : memref<18x8x1xf32, #tpu.memory_space<vmem>>, vector<1x8x1xf32>
    %41 = vector.shape_cast %40 : vector<1x8x1xf32> to vector<8x1xf32>
    %42 = vector.shape_cast %39 : vector<8x1xf32> to vector<1x8x1xf32>
    tpu.vector_store %arg3[%c5_29, %c0_30, %c0_31], %42 {strides = array<i32>} : memref<18x8x1xf32, #tpu.memory_space<vmem>>, vector<1x8x1xf32>,
    %c6 = arith.constant 6 : index
    %c0_32 = arith.constant 0 : index
    %c0_33 = arith.constant 0 : index
    %43 = vector.load %arg3[%c6, %c0_32, %c0_33] : memref<18x8x1xf32, #tpu.memory_space<vmem>>, vector<1x8x1xf32>
    %44 = vector.shape_cast %43 : vector<1x8x1xf32> to vector<8x1xf32>
    %cst_34 = arith.constant dense<0.000000e+00> : vector<8xf32>
    %45 = vector.multi_reduction <add>, %22, %cst_34 [1] : vector<8x512xf32> to vector<8xf32>
    %46 = vector.shape_cast %45 : vector<8xf32> to vector<8x1xf32>
    %47 = arith.addf %44, %46 : vector<8x1xf32>
    %c6_35 = arith.constant 6 : index
    %c0_36 = arith.constant 0 : index
    %c0_37 = arith.constant 0 : index
    %48 = vector.load %arg3[%c6_35, %c0_36, %c0_37] : memref<18x8x1xf32, #tpu.memory_space<vmem>>, vector<1x8x1xf32>
    %49 = vector.shape_cast %48 : vector<1x8x1xf32> to vector<8x1xf32>
    %50 = vector.shape_cast %47 : vector<8x1xf32> to vector<1x8x1xf32>
    tpu.vector_store %arg3[%c6_35, %c0_36, %c0_37], %50 {strides = array<i32>} : memref<18x8x1xf32, #tpu.memory_space<vmem>>, vector<1x8x1xf32>,
    %c7 = arith.constant 7 : index
    %c0_38 = arith.constant 0 : index
    %c0_39 = arith.constant 0 : index
    %51 = vector.load %arg3[%c7, %c0_38, %c0_39] : memref<18x8x1xf32, #tpu.memory_space<vmem>>, vector<1x8x1xf32>
    %52 = vector.shape_cast %51 : vector<1x8x1xf32> to vector<8x1xf32>
    %cst_40 = arith.constant dense<0.000000e+00> : vector<8xf32>
    %53 = vector.multi_reduction <add>, %26, %cst_40 [1] : vector<8x512xf32> to vector<8xf32>
    %54 = vector.shape_cast %53 : vector<8xf32> to vector<8x1xf32>
    %55 = arith.addf %52, %54 : vector<8x1xf32>
    %c7_41 = arith.constant 7 : index
    %c0_42 = arith.constant 0 : index
    %c0_43 = arith.constant 0 : index
    %56 = vector.load %arg3[%c7_41, %c0_42, %c0_43] : memref<18x8x1xf32, #tpu.memory_space<vmem>>, vector<1x8x1xf32>
    %57 = vector.shape_cast %56 : vector<1x8x1xf32> to vector<8x1xf32>
    %58 = vector.shape_cast %55 : vector<8x1xf32> to vector<1x8x1xf32>
    tpu.vector_store %arg3[%c7_41, %c0_42, %c0_43], %58 {strides = array<i32>} : memref<18x8x1xf32, #tpu.memory_space<vmem>>, vector<1x8x1xf32>,
    %c8 = arith.constant 8 : index
    %c0_44 = arith.constant 0 : index
    %c0_45 = arith.constant 0 : index
    %59 = vector.load %arg3[%c8, %c0_44, %c0_45] : memref<18x8x1xf32, #tpu.memory_space<vmem>>, vector<1x8x1xf32>
    %60 = vector.shape_cast %59 : vector<1x8x1xf32> to vector<8x1xf32>
    %61 = arith.mulf %14, %14 : vector<8x512xf32>
    %cst_46 = arith.constant dense<0.000000e+00> : vector<8xf32>
    %62 = vector.multi_reduction <add>, %61, %cst_46 [1] : vector<8x512xf32> to vector<8xf32>
    %63 = vector.shape_cast %62 : vector<8xf32> to vector<8x1xf32>
    %64 = arith.addf %60, %63 : vector<8x1xf32>
    %c8_47 = arith.constant 8 : index
    %c0_48 = arith.constant 0 : index
    %c0_49 = arith.constant 0 : index
    %65 = vector.load %arg3[%c8_47, %c0_48, %c0_49] : memref<18x8x1xf32, #tpu.memory_space<vmem>>, vector<1x8x1xf32>
    %66 = vector.shape_cast %65 : vector<1x8x1xf32> to vector<8x1xf32>
    %67 = vector.shape_cast %64 : vector<8x1xf32> to vector<1x8x1xf32>
    tpu.vector_store %arg3[%c8_47, %c0_48, %c0_49], %67 {strides = array<i32>} : memref<18x8x1xf32, #tpu.memory_space<vmem>>, vector<1x8x1xf32>,
    %c9 = arith.constant 9 : index
    %c0_50 = arith.constant 0 : index
    %c0_51 = arith.constant 0 : index
    %68 = vector.load %arg3[%c9, %c0_50, %c0_51] : memref<18x8x1xf32, #tpu.memory_space<vmem>>, vector<1x8x1xf32>
    %69 = vector.shape_cast %68 : vector<1x8x1xf32> to vector<8x1xf32>
    %70 = arith.mulf %14, %18 : vector<8x512xf32>
    %cst_52 = arith.constant dense<0.000000e+00> : vector<8xf32>
    %71 = vector.multi_reduction <add>, %70, %cst_52 [1] : vector<8x512xf32> to vector<8xf32>
    %72 = vector.shape_cast %71 : vector<8xf32> to vector<8x1xf32>
    %73 = arith.addf %69, %72 : vector<8x1xf32>
    %c9_53 = arith.constant 9 : index
    %c0_54 = arith.constant 0 : index
    %c0_55 = arith.constant 0 : index
    %74 = vector.load %arg3[%c9_53, %c0_54, %c0_55] : memref<18x8x1xf32, #tpu.memory_space<vmem>>, vector<1x8x1xf32>
    %75 = vector.shape_cast %74 : vector<1x8x1xf32> to vector<8x1xf32>
    %76 = vector.shape_cast %73 : vector<8x1xf32> to vector<1x8x1xf32>
    tpu.vector_store %arg3[%c9_53, %c0_54, %c0_55], %76 {strides = array<i32>} : memref<18x8x1xf32, #tpu.memory_space<vmem>>, vector<1x8x1xf32>,
    %c10 = arith.constant 10 : index
    %c0_56 = arith.constant 0 : index
    %c0_57 = arith.constant 0 : index
    %77 = vector.load %arg3[%c10, %c0_56, %c0_57] : memref<18x8x1xf32, #tpu.memory_space<vmem>>, vector<1x8x1xf32>
    %78 = vector.shape_cast %77 : vector<1x8x1xf32> to vector<8x1xf32>
    %79 = arith.mulf %14, %22 : vector<8x512xf32>
    %cst_58 = arith.constant dense<0.000000e+00> : vector<8xf32>
    %80 = vector.multi_reduction <add>, %79, %cst_58 [1] : vector<8x512xf32> to vector<8xf32>
    %81 = vector.shape_cast %80 : vector<8xf32> to vector<8x1xf32>
    %82 = arith.addf %78, %81 : vector<8x1xf32>
    %c10_59 = arith.constant 10 : index
    %c0_60 = arith.constant 0 : index
    %c0_61 = arith.constant 0 : index
    %83 = vector.load %arg3[%c10_59, %c0_60, %c0_61] : memref<18x8x1xf32, #tpu.memory_space<vmem>>, vector<1x8x1xf32>
    %84 = vector.shape_cast %83 : vector<1x8x1xf32> to vector<8x1xf32>
    %85 = vector.shape_cast %82 : vector<8x1xf32> to vector<1x8x1xf32>
    tpu.vector_store %arg3[%c10_59, %c0_60, %c0_61], %85 {strides = array<i32>} : memref<18x8x1xf32, #tpu.memory_space<vmem>>, vector<1x8x1xf32>,
    %c11 = arith.constant 11 : index
    %c0_62 = arith.constant 0 : index
    %c0_63 = arith.constant 0 : index
    %86 = vector.load %arg3[%c11, %c0_62, %c0_63] : memref<18x8x1xf32, #tpu.memory_space<vmem>>, vector<1x8x1xf32>
    %87 = vector.shape_cast %86 : vector<1x8x1xf32> to vector<8x1xf32>
    %88 = arith.mulf %14, %26 : vector<8x512xf32>
    %cst_64 = arith.constant dense<0.000000e+00> : vector<8xf32>
    %89 = vector.multi_reduction <add>, %88, %cst_64 [1] : vector<8x512xf32> to vector<8xf32>
    %90 = vector.shape_cast %89 : vector<8xf32> to vector<8x1xf32>
    %91 = arith.addf %87, %90 : vector<8x1xf32>
    %c11_65 = arith.constant 11 : index
    %c0_66 = arith.constant 0 : index
    %c0_67 = arith.constant 0 : index
    %92 = vector.load %arg3[%c11_65, %c0_66, %c0_67] : memref<18x8x1xf32, #tpu.memory_space<vmem>>, vector<1x8x1xf32>
    %93 = vector.shape_cast %92 : vector<1x8x1xf32> to vector<8x1xf32>
    %94 = vector.shape_cast %91 : vector<8x1xf32> to vector<1x8x1xf32>
    tpu.vector_store %arg3[%c11_65, %c0_66, %c0_67], %94 {strides = array<i32>} : memref<18x8x1xf32, #tpu.memory_space<vmem>>, vector<1x8x1xf32>,
    %c12 = arith.constant 12 : index
    %c0_68 = arith.constant 0 : index
    %c0_69 = arith.constant 0 : index
    %95 = vector.load %arg3[%c12, %c0_68, %c0_69] : memref<18x8x1xf32, #tpu.memory_space<vmem>>, vector<1x8x1xf32>
    %96 = vector.shape_cast %95 : vector<1x8x1xf32> to vector<8x1xf32>
    %97 = arith.mulf %18, %18 : vector<8x512xf32>
    %cst_70 = arith.constant dense<0.000000e+00> : vector<8xf32>
    %98 = vector.multi_reduction <add>, %97, %cst_70 [1] : vector<8x512xf32> to vector<8xf32>
    %99 = vector.shape_cast %98 : vector<8xf32> to vector<8x1xf32>
    %100 = arith.addf %96, %99 : vector<8x1xf32>
    %c12_71 = arith.constant 12 : index
    %c0_72 = arith.constant 0 : index
    %c0_73 = arith.constant 0 : index
    %101 = vector.load %arg3[%c12_71, %c0_72, %c0_73] : memref<18x8x1xf32, #tpu.memory_space<vmem>>, vector<1x8x1xf32>
    %102 = vector.shape_cast %101 : vector<1x8x1xf32> to vector<8x1xf32>
    %103 = vector.shape_cast %100 : vector<8x1xf32> to vector<1x8x1xf32>
    tpu.vector_store %arg3[%c12_71, %c0_72, %c0_73], %103 {strides = array<i32>} : memref<18x8x1xf32, #tpu.memory_space<vmem>>, vector<1x8x1xf32>,
    %c13 = arith.constant 13 : index
    %c0_74 = arith.constant 0 : index
    %c0_75 = arith.constant 0 : index
    %104 = vector.load %arg3[%c13, %c0_74, %c0_75] : memref<18x8x1xf32, #tpu.memory_space<vmem>>, vector<1x8x1xf32>
    %105 = vector.shape_cast %104 : vector<1x8x1xf32> to vector<8x1xf32>
    %106 = arith.mulf %18, %22 : vector<8x512xf32>
    %cst_76 = arith.constant dense<0.000000e+00> : vector<8xf32>
    %107 = vector.multi_reduction <add>, %106, %cst_76 [1] : vector<8x512xf32> to vector<8xf32>
    %108 = vector.shape_cast %107 : vector<8xf32> to vector<8x1xf32>
    %109 = arith.addf %105, %108 : vector<8x1xf32>
    %c13_77 = arith.constant 13 : index
    %c0_78 = arith.constant 0 : index
    %c0_79 = arith.constant 0 : index
    %110 = vector.load %arg3[%c13_77, %c0_78, %c0_79] : memref<18x8x1xf32, #tpu.memory_space<vmem>>, vector<1x8x1xf32>
    %111 = vector.shape_cast %110 : vector<1x8x1xf32> to vector<8x1xf32>
    %112 = vector.shape_cast %109 : vector<8x1xf32> to vector<1x8x1xf32>
    tpu.vector_store %arg3[%c13_77, %c0_78, %c0_79], %112 {strides = array<i32>} : memref<18x8x1xf32, #tpu.memory_space<vmem>>, vector<1x8x1xf32>,
    %c14 = arith.constant 14 : index
    %c0_80 = arith.constant 0 : index
    %c0_81 = arith.constant 0 : index
    %113 = vector.load %arg3[%c14, %c0_80, %c0_81] : memref<18x8x1xf32, #tpu.memory_space<vmem>>, vector<1x8x1xf32>
    %114 = vector.shape_cast %113 : vector<1x8x1xf32> to vector<8x1xf32>
    %115 = arith.mulf %18, %26 : vector<8x512xf32>
    %cst_82 = arith.constant dense<0.000000e+00> : vector<8xf32>
    %116 = vector.multi_reduction <add>, %115, %cst_82 [1] : vector<8x512xf32> to vector<8xf32>
    %117 = vector.shape_cast %116 : vector<8xf32> to vector<8x1xf32>
    %118 = arith.addf %114, %117 : vector<8x1xf32>
    %c14_83 = arith.constant 14 : index
    %c0_84 = arith.constant 0 : index
    %c0_85 = arith.constant 0 : index
    %119 = vector.load %arg3[%c14_83, %c0_84, %c0_85] : memref<18x8x1xf32, #tpu.memory_space<vmem>>, vector<1x8x1xf32>
    %120 = vector.shape_cast %119 : vector<1x8x1xf32> to vector<8x1xf32>
    %121 = vector.shape_cast %118 : vector<8x1xf32> to vector<1x8x1xf32>
    tpu.vector_store %arg3[%c14_83, %c0_84, %c0_85], %121 {strides = array<i32>} : memref<18x8x1xf32, #tpu.memory_space<vmem>>, vector<1x8x1xf32>,
    %c15 = arith.constant 15 : index
    %c0_86 = arith.constant 0 : index
    %c0_87 = arith.constant 0 : index
    %122 = vector.load %arg3[%c15, %c0_86, %c0_87] : memref<18x8x1xf32, #tpu.memory_space<vmem>>, vector<1x8x1xf32>
    %123 = vector.shape_cast %122 : vector<1x8x1xf32> to vector<8x1xf32>
    %124 = arith.mulf %22, %22 : vector<8x512xf32>
    %cst_88 = arith.constant dense<0.000000e+00> : vector<8xf32>
    %125 = vector.multi_reduction <add>, %124, %cst_88 [1] : vector<8x512xf32> to vector<8xf32>
    %126 = vector.shape_cast %125 : vector<8xf32> to vector<8x1xf32>
    %127 = arith.addf %123, %126 : vector<8x1xf32>
    %c15_89 = arith.constant 15 : index
    %c0_90 = arith.constant 0 : index
    %c0_91 = arith.constant 0 : index
    %128 = vector.load %arg3[%c15_89, %c0_90, %c0_91] : memref<18x8x1xf32, #tpu.memory_space<vmem>>, vector<1x8x1xf32>
    %129 = vector.shape_cast %128 : vector<1x8x1xf32> to vector<8x1xf32>
    %130 = vector.shape_cast %127 : vector<8x1xf32> to vector<1x8x1xf32>
    tpu.vector_store %arg3[%c15_89, %c0_90, %c0_91], %130 {strides = array<i32>} : memref<18x8x1xf32, #tpu.memory_space<vmem>>, vector<1x8x1xf32>,
    %c16 = arith.constant 16 : index
    %c0_92 = arith.constant 0 : index
    %c0_93 = arith.constant 0 : index
    %131 = vector.load %arg3[%c16, %c0_92, %c0_93] : memref<18x8x1xf32, #tpu.memory_space<vmem>>, vector<1x8x1xf32>
    %132 = vector.shape_cast %131 : vector<1x8x1xf32> to vector<8x1xf32>
    %133 = arith.mulf %22, %26 : vector<8x512xf32>
    %cst_94 = arith.constant dense<0.000000e+00> : vector<8xf32>
    %134 = vector.multi_reduction <add>, %133, %cst_94 [1] : vector<8x512xf32> to vector<8xf32>
    %135 = vector.shape_cast %134 : vector<8xf32> to vector<8x1xf32>
    %136 = arith.addf %132, %135 : vector<8x1xf32>
    %c16_95 = arith.constant 16 : index
    %c0_96 = arith.constant 0 : index
    %c0_97 = arith.constant 0 : index
    %137 = vector.load %arg3[%c16_95, %c0_96, %c0_97] : memref<18x8x1xf32, #tpu.memory_space<vmem>>, vector<1x8x1xf32>
    %138 = vector.shape_cast %137 : vector<1x8x1xf32> to vector<8x1xf32>
    %139 = vector.shape_cast %136 : vector<8x1xf32> to vector<1x8x1xf32>
    tpu.vector_store %arg3[%c16_95, %c0_96, %c0_97], %139 {strides = array<i32>} : memref<18x8x1xf32, #tpu.memory_space<vmem>>, vector<1x8x1xf32>,
    %c17 = arith.constant 17 : index
    %c0_98 = arith.constant 0 : index
    %c0_99 = arith.constant 0 : index
    %140 = vector.load %arg3[%c17, %c0_98, %c0_99] : memref<18x8x1xf32, #tpu.memory_space<vmem>>, vector<1x8x1xf32>
    %141 = vector.shape_cast %140 : vector<1x8x1xf32> to vector<8x1xf32>
    %142 = arith.mulf %26, %26 : vector<8x512xf32>
    %cst_100 = arith.constant dense<0.000000e+00> : vector<8xf32>
    %143 = vector.multi_reduction <add>, %142, %cst_100 [1] : vector<8x512xf32> to vector<8xf32>
    %144 = vector.shape_cast %143 : vector<8xf32> to vector<8x1xf32>
    %145 = arith.addf %141, %144 : vector<8x1xf32>
    %c17_101 = arith.constant 17 : index
    %c0_102 = arith.constant 0 : index
    %c0_103 = arith.constant 0 : index
    %146 = vector.load %arg3[%c17_101, %c0_102, %c0_103] : memref<18x8x1xf32, #tpu.memory_space<vmem>>, vector<1x8x1xf32>
    %147 = vector.shape_cast %146 : vector<1x8x1xf32> to vector<8x1xf32>
    %148 = vector.shape_cast %145 : vector<8x1xf32> to vector<1x8x1xf32>
    tpu.vector_store %arg3[%c17_101, %c0_102, %c0_103], %148 {strides = array<i32>} : memref<18x8x1xf32, #tpu.memory_space<vmem>>, vector<1x8x1xf32>,
    return
  }
  func.func @transform_0(%arg0: i32, %arg1: i32) -> (i32, i32, i32) {
    %c0_i32 = arith.constant 0 : i32
    %c0_i32_0 = arith.constant 0 : i32
    return %c0_i32, %arg0, %arg1 : i32, i32, i32
  }
  func.func @transform_1(%arg0: i32, %arg1: i32) -> (i32, i32, i32) {
    %c0_i32 = arith.constant 0 : i32
    %c0_i32_0 = arith.constant 0 : i32
    %c0_i32_1 = arith.constant 0 : i32
    return %c0_i32, %arg0, %c0_i32_0 : i32, i32, i32
  }
}

module attributes {stable_mosaic.version = 11 : i64} {
  func.func @_apply_kernel(%arg0: i32, %arg1: i32, %arg2: memref<20x8x1xf32, #tpu.memory_space<vmem>>, %arg3: memref<4x8x512xf32, #tpu.memory_space<vmem>>, %arg4: memref<4x8x512xf32, #tpu.memory_space<vmem>>) attributes {dimension_semantics = [#tpu.dimension_semantics<parallel>, #tpu.dimension_semantics<parallel>], iteration_bounds = array<i64: 1, 1>, scalar_prefetch = 0 : i64, scratch_operands = 0 : i64, tpu.core_type = #tpu.core_type<tc>, window_params = [{transform_indices = @transform_0, window_bounds = array<i64: 20, 8, 1>}, {transform_indices = @transform_1, window_bounds = array<i64: 4, 8, 512>}, {transform_indices = @transform_2, window_bounds = array<i64: 4, 8, 512>}]} {
    %c0 = arith.constant 0 : index
    %c0_0 = arith.constant 0 : index
    %c0_1 = arith.constant 0 : index
    %0 = vector.load %arg3[%c0, %c0_0, %c0_1] : memref<4x8x512xf32, #tpu.memory_space<vmem>>, vector<1x8x512xf32>
    %1 = vector.shape_cast %0 : vector<1x8x512xf32> to vector<8x512xf32>
    %c1 = arith.constant 1 : index
    %c0_2 = arith.constant 0 : index
    %c0_3 = arith.constant 0 : index
    %2 = vector.load %arg3[%c1, %c0_2, %c0_3] : memref<4x8x512xf32, #tpu.memory_space<vmem>>, vector<1x8x512xf32>
    %3 = vector.shape_cast %2 : vector<1x8x512xf32> to vector<8x512xf32>
    %c2 = arith.constant 2 : index
    %c0_4 = arith.constant 0 : index
    %c0_5 = arith.constant 0 : index
    %4 = vector.load %arg3[%c2, %c0_4, %c0_5] : memref<4x8x512xf32, #tpu.memory_space<vmem>>, vector<1x8x512xf32>
    %5 = vector.shape_cast %4 : vector<1x8x512xf32> to vector<8x512xf32>
    %c3 = arith.constant 3 : index
    %c0_6 = arith.constant 0 : index
    %c0_7 = arith.constant 0 : index
    %6 = vector.load %arg3[%c3, %c0_6, %c0_7] : memref<4x8x512xf32, #tpu.memory_space<vmem>>, vector<1x8x512xf32>
    %7 = vector.shape_cast %6 : vector<1x8x512xf32> to vector<8x512xf32>
    %c16 = arith.constant 16 : index
    %c0_8 = arith.constant 0 : index
    %c0_9 = arith.constant 0 : index
    %8 = vector.load %arg2[%c16, %c0_8, %c0_9] : memref<20x8x1xf32, #tpu.memory_space<vmem>>, vector<1x8x1xf32>
    %9 = vector.shape_cast %8 : vector<1x8x1xf32> to vector<8x1xf32>
    %c0_10 = arith.constant 0 : index
    %c0_11 = arith.constant 0 : index
    %c0_12 = arith.constant 0 : index
    %10 = vector.load %arg2[%c0_10, %c0_11, %c0_12] : memref<20x8x1xf32, #tpu.memory_space<vmem>>, vector<1x8x1xf32>
    %11 = vector.shape_cast %10 : vector<1x8x1xf32> to vector<8x1xf32>
    %12 = vector.broadcast %11 : vector<8x1xf32> to vector<8x512xf32>
    %13 = arith.mulf %12, %1 : vector<8x512xf32>
    %14 = vector.broadcast %9 : vector<8x1xf32> to vector<8x512xf32>
    %15 = arith.addf %14, %13 : vector<8x512xf32>
    %c1_13 = arith.constant 1 : index
    %c0_14 = arith.constant 0 : index
    %c0_15 = arith.constant 0 : index
    %16 = vector.load %arg2[%c1_13, %c0_14, %c0_15] : memref<20x8x1xf32, #tpu.memory_space<vmem>>, vector<1x8x1xf32>
    %17 = vector.shape_cast %16 : vector<1x8x1xf32> to vector<8x1xf32>
    %18 = vector.broadcast %17 : vector<8x1xf32> to vector<8x512xf32>
    %19 = arith.mulf %18, %3 : vector<8x512xf32>
    %20 = arith.addf %15, %19 : vector<8x512xf32>
    %c2_16 = arith.constant 2 : index
    %c0_17 = arith.constant 0 : index
    %c0_18 = arith.constant 0 : index
    %21 = vector.load %arg2[%c2_16, %c0_17, %c0_18] : memref<20x8x1xf32, #tpu.memory_space<vmem>>, vector<1x8x1xf32>
    %22 = vector.shape_cast %21 : vector<1x8x1xf32> to vector<8x1xf32>
    %23 = vector.broadcast %22 : vector<8x1xf32> to vector<8x512xf32>
    %24 = arith.mulf %23, %5 : vector<8x512xf32>
    %25 = arith.addf %20, %24 : vector<8x512xf32>
    %c3_19 = arith.constant 3 : index
    %c0_20 = arith.constant 0 : index
    %c0_21 = arith.constant 0 : index
    %26 = vector.load %arg2[%c3_19, %c0_20, %c0_21] : memref<20x8x1xf32, #tpu.memory_space<vmem>>, vector<1x8x1xf32>
    %27 = vector.shape_cast %26 : vector<1x8x1xf32> to vector<8x1xf32>
    %28 = vector.broadcast %27 : vector<8x1xf32> to vector<8x512xf32>
    %29 = arith.mulf %28, %7 : vector<8x512xf32>
    %30 = arith.addf %25, %29 : vector<8x512xf32>
    %c0_22 = arith.constant 0 : index
    %c0_23 = arith.constant 0 : index
    %c0_24 = arith.constant 0 : index
    %31 = vector.load %arg4[%c0_22, %c0_23, %c0_24] : memref<4x8x512xf32, #tpu.memory_space<vmem>>, vector<1x8x512xf32>
    %32 = vector.shape_cast %31 : vector<1x8x512xf32> to vector<8x512xf32>
    %33 = vector.shape_cast %30 : vector<8x512xf32> to vector<1x8x512xf32>
    tpu.vector_store %arg4[%c0_22, %c0_23, %c0_24], %33 {strides = array<i32>} : memref<4x8x512xf32, #tpu.memory_space<vmem>>, vector<1x8x512xf32>,
    %c17 = arith.constant 17 : index
    %c0_25 = arith.constant 0 : index
    %c0_26 = arith.constant 0 : index
    %34 = vector.load %arg2[%c17, %c0_25, %c0_26] : memref<20x8x1xf32, #tpu.memory_space<vmem>>, vector<1x8x1xf32>
    %35 = vector.shape_cast %34 : vector<1x8x1xf32> to vector<8x1xf32>
    %c4 = arith.constant 4 : index
    %c0_27 = arith.constant 0 : index
    %c0_28 = arith.constant 0 : index
    %36 = vector.load %arg2[%c4, %c0_27, %c0_28] : memref<20x8x1xf32, #tpu.memory_space<vmem>>, vector<1x8x1xf32>
    %37 = vector.shape_cast %36 : vector<1x8x1xf32> to vector<8x1xf32>
    %38 = vector.broadcast %37 : vector<8x1xf32> to vector<8x512xf32>
    %39 = arith.mulf %38, %1 : vector<8x512xf32>
    %40 = vector.broadcast %35 : vector<8x1xf32> to vector<8x512xf32>
    %41 = arith.addf %40, %39 : vector<8x512xf32>
    %c5 = arith.constant 5 : index
    %c0_29 = arith.constant 0 : index
    %c0_30 = arith.constant 0 : index
    %42 = vector.load %arg2[%c5, %c0_29, %c0_30] : memref<20x8x1xf32, #tpu.memory_space<vmem>>, vector<1x8x1xf32>
    %43 = vector.shape_cast %42 : vector<1x8x1xf32> to vector<8x1xf32>
    %44 = vector.broadcast %43 : vector<8x1xf32> to vector<8x512xf32>
    %45 = arith.mulf %44, %3 : vector<8x512xf32>
    %46 = arith.addf %41, %45 : vector<8x512xf32>
    %c6 = arith.constant 6 : index
    %c0_31 = arith.constant 0 : index
    %c0_32 = arith.constant 0 : index
    %47 = vector.load %arg2[%c6, %c0_31, %c0_32] : memref<20x8x1xf32, #tpu.memory_space<vmem>>, vector<1x8x1xf32>
    %48 = vector.shape_cast %47 : vector<1x8x1xf32> to vector<8x1xf32>
    %49 = vector.broadcast %48 : vector<8x1xf32> to vector<8x512xf32>
    %50 = arith.mulf %49, %5 : vector<8x512xf32>
    %51 = arith.addf %46, %50 : vector<8x512xf32>
    %c7 = arith.constant 7 : index
    %c0_33 = arith.constant 0 : index
    %c0_34 = arith.constant 0 : index
    %52 = vector.load %arg2[%c7, %c0_33, %c0_34] : memref<20x8x1xf32, #tpu.memory_space<vmem>>, vector<1x8x1xf32>
    %53 = vector.shape_cast %52 : vector<1x8x1xf32> to vector<8x1xf32>
    %54 = vector.broadcast %53 : vector<8x1xf32> to vector<8x512xf32>
    %55 = arith.mulf %54, %7 : vector<8x512xf32>
    %56 = arith.addf %51, %55 : vector<8x512xf32>
    %c1_35 = arith.constant 1 : index
    %c0_36 = arith.constant 0 : index
    %c0_37 = arith.constant 0 : index
    %57 = vector.load %arg4[%c1_35, %c0_36, %c0_37] : memref<4x8x512xf32, #tpu.memory_space<vmem>>, vector<1x8x512xf32>
    %58 = vector.shape_cast %57 : vector<1x8x512xf32> to vector<8x512xf32>
    %59 = vector.shape_cast %56 : vector<8x512xf32> to vector<1x8x512xf32>
    tpu.vector_store %arg4[%c1_35, %c0_36, %c0_37], %59 {strides = array<i32>} : memref<4x8x512xf32, #tpu.memory_space<vmem>>, vector<1x8x512xf32>,
    %c18 = arith.constant 18 : index
    %c0_38 = arith.constant 0 : index
    %c0_39 = arith.constant 0 : index
    %60 = vector.load %arg2[%c18, %c0_38, %c0_39] : memref<20x8x1xf32, #tpu.memory_space<vmem>>, vector<1x8x1xf32>
    %61 = vector.shape_cast %60 : vector<1x8x1xf32> to vector<8x1xf32>
    %c8 = arith.constant 8 : index
    %c0_40 = arith.constant 0 : index
    %c0_41 = arith.constant 0 : index
    %62 = vector.load %arg2[%c8, %c0_40, %c0_41] : memref<20x8x1xf32, #tpu.memory_space<vmem>>, vector<1x8x1xf32>
    %63 = vector.shape_cast %62 : vector<1x8x1xf32> to vector<8x1xf32>
    %64 = vector.broadcast %63 : vector<8x1xf32> to vector<8x512xf32>
    %65 = arith.mulf %64, %1 : vector<8x512xf32>
    %66 = vector.broadcast %61 : vector<8x1xf32> to vector<8x512xf32>
    %67 = arith.addf %66, %65 : vector<8x512xf32>
    %c9 = arith.constant 9 : index
    %c0_42 = arith.constant 0 : index
    %c0_43 = arith.constant 0 : index
    %68 = vector.load %arg2[%c9, %c0_42, %c0_43] : memref<20x8x1xf32, #tpu.memory_space<vmem>>, vector<1x8x1xf32>
    %69 = vector.shape_cast %68 : vector<1x8x1xf32> to vector<8x1xf32>
    %70 = vector.broadcast %69 : vector<8x1xf32> to vector<8x512xf32>
    %71 = arith.mulf %70, %3 : vector<8x512xf32>
    %72 = arith.addf %67, %71 : vector<8x512xf32>
    %c10 = arith.constant 10 : index
    %c0_44 = arith.constant 0 : index
    %c0_45 = arith.constant 0 : index
    %73 = vector.load %arg2[%c10, %c0_44, %c0_45] : memref<20x8x1xf32, #tpu.memory_space<vmem>>, vector<1x8x1xf32>
    %74 = vector.shape_cast %73 : vector<1x8x1xf32> to vector<8x1xf32>
    %75 = vector.broadcast %74 : vector<8x1xf32> to vector<8x512xf32>
    %76 = arith.mulf %75, %5 : vector<8x512xf32>
    %77 = arith.addf %72, %76 : vector<8x512xf32>
    %c11 = arith.constant 11 : index
    %c0_46 = arith.constant 0 : index
    %c0_47 = arith.constant 0 : index
    %78 = vector.load %arg2[%c11, %c0_46, %c0_47] : memref<20x8x1xf32, #tpu.memory_space<vmem>>, vector<1x8x1xf32>
    %79 = vector.shape_cast %78 : vector<1x8x1xf32> to vector<8x1xf32>
    %80 = vector.broadcast %79 : vector<8x1xf32> to vector<8x512xf32>
    %81 = arith.mulf %80, %7 : vector<8x512xf32>
    %82 = arith.addf %77, %81 : vector<8x512xf32>
    %c2_48 = arith.constant 2 : index
    %c0_49 = arith.constant 0 : index
    %c0_50 = arith.constant 0 : index
    %83 = vector.load %arg4[%c2_48, %c0_49, %c0_50] : memref<4x8x512xf32, #tpu.memory_space<vmem>>, vector<1x8x512xf32>
    %84 = vector.shape_cast %83 : vector<1x8x512xf32> to vector<8x512xf32>
    %85 = vector.shape_cast %82 : vector<8x512xf32> to vector<1x8x512xf32>
    tpu.vector_store %arg4[%c2_48, %c0_49, %c0_50], %85 {strides = array<i32>} : memref<4x8x512xf32, #tpu.memory_space<vmem>>, vector<1x8x512xf32>,
    %c19 = arith.constant 19 : index
    %c0_51 = arith.constant 0 : index
    %c0_52 = arith.constant 0 : index
    %86 = vector.load %arg2[%c19, %c0_51, %c0_52] : memref<20x8x1xf32, #tpu.memory_space<vmem>>, vector<1x8x1xf32>
    %87 = vector.shape_cast %86 : vector<1x8x1xf32> to vector<8x1xf32>
    %c12 = arith.constant 12 : index
    %c0_53 = arith.constant 0 : index
    %c0_54 = arith.constant 0 : index
    %88 = vector.load %arg2[%c12, %c0_53, %c0_54] : memref<20x8x1xf32, #tpu.memory_space<vmem>>, vector<1x8x1xf32>
    %89 = vector.shape_cast %88 : vector<1x8x1xf32> to vector<8x1xf32>
    %90 = vector.broadcast %89 : vector<8x1xf32> to vector<8x512xf32>
    %91 = arith.mulf %90, %1 : vector<8x512xf32>
    %92 = vector.broadcast %87 : vector<8x1xf32> to vector<8x512xf32>
    %93 = arith.addf %92, %91 : vector<8x512xf32>
    %c13 = arith.constant 13 : index
    %c0_55 = arith.constant 0 : index
    %c0_56 = arith.constant 0 : index
    %94 = vector.load %arg2[%c13, %c0_55, %c0_56] : memref<20x8x1xf32, #tpu.memory_space<vmem>>, vector<1x8x1xf32>
    %95 = vector.shape_cast %94 : vector<1x8x1xf32> to vector<8x1xf32>
    %96 = vector.broadcast %95 : vector<8x1xf32> to vector<8x512xf32>
    %97 = arith.mulf %96, %3 : vector<8x512xf32>
    %98 = arith.addf %93, %97 : vector<8x512xf32>
    %c14 = arith.constant 14 : index
    %c0_57 = arith.constant 0 : index
    %c0_58 = arith.constant 0 : index
    %99 = vector.load %arg2[%c14, %c0_57, %c0_58] : memref<20x8x1xf32, #tpu.memory_space<vmem>>, vector<1x8x1xf32>
    %100 = vector.shape_cast %99 : vector<1x8x1xf32> to vector<8x1xf32>
    %101 = vector.broadcast %100 : vector<8x1xf32> to vector<8x512xf32>
    %102 = arith.mulf %101, %5 : vector<8x512xf32>
    %103 = arith.addf %98, %102 : vector<8x512xf32>
    %c15 = arith.constant 15 : index
    %c0_59 = arith.constant 0 : index
    %c0_60 = arith.constant 0 : index
    %104 = vector.load %arg2[%c15, %c0_59, %c0_60] : memref<20x8x1xf32, #tpu.memory_space<vmem>>, vector<1x8x1xf32>
    %105 = vector.shape_cast %104 : vector<1x8x1xf32> to vector<8x1xf32>
    %106 = vector.broadcast %105 : vector<8x1xf32> to vector<8x512xf32>
    %107 = arith.mulf %106, %7 : vector<8x512xf32>
    %108 = arith.addf %103, %107 : vector<8x512xf32>
    %c3_61 = arith.constant 3 : index
    %c0_62 = arith.constant 0 : index
    %c0_63 = arith.constant 0 : index
    %109 = vector.load %arg4[%c3_61, %c0_62, %c0_63] : memref<4x8x512xf32, #tpu.memory_space<vmem>>, vector<1x8x512xf32>
    %110 = vector.shape_cast %109 : vector<1x8x512xf32> to vector<8x512xf32>
    %111 = vector.shape_cast %108 : vector<8x512xf32> to vector<1x8x512xf32>
    tpu.vector_store %arg4[%c3_61, %c0_62, %c0_63], %111 {strides = array<i32>} : memref<4x8x512xf32, #tpu.memory_space<vmem>>, vector<1x8x512xf32>,
    return
  }
  func.func @transform_0(%arg0: i32, %arg1: i32) -> (i32, i32, i32) {
    %c0_i32 = arith.constant 0 : i32
    %c0_i32_0 = arith.constant 0 : i32
    %c0_i32_1 = arith.constant 0 : i32
    return %c0_i32, %arg0, %c0_i32_0 : i32, i32, i32
  }
  func.func @transform_1(%arg0: i32, %arg1: i32) -> (i32, i32, i32) {
    %c0_i32 = arith.constant 0 : i32
    %c0_i32_0 = arith.constant 0 : i32
    return %c0_i32, %arg0, %arg1 : i32, i32, i32
  }
  func.func @transform_2(%arg0: i32, %arg1: i32) -> (i32, i32, i32) {
    %c0_i32 = arith.constant 0 : i32
    %c0_i32_0 = arith.constant 0 : i32
    return %c0_i32, %arg0, %arg1 : i32, i32, i32
  }
}

</mosaic_0001>

<bundles_post_ra>
// kernel: clifford_group_norm_pallas.2
= control target key start
LH: loop header
LB: loop body
LE: loop exit
PB: predicated region body
PF: predicated region fallthrough
CT: control target
= control target key end

     0   :  { %v380_v28 = vmov 512.0   ;;  %v381_v29 = vmov 0   ;;  %vm44_vm1 = vcmask 7168   ;;  %s767_s0 = inlined_call_operand.vmem [shape: f32[4,8,512], index: 0, kind: input, shape index: {}]   ;;  %s768_s1 = inlined_call_operand.vmem [shape: f32[18,8,1], index: 1, kind: output, shape index: {}]  }
   0x1   :  { %v396_v0 = vld [vmem:[%s767_s0 + $0x40] sm:$0xff]  ;;  %v401_v1 = vld [vmem:[%s767_s0 + $0x48] sm:$0xff]  ;;  %v406_v2 = vld [vmem:[%s767_s0 + $0x50] sm:$0xff]  ;;  %378 = vrcp.f32 %v380_v28  ;;  %376 = vset.pattern.permute.xlu0 %v381_v29  ;;  %377 = vset.pattern.permute.xlu1 %v381_v29 }
   0x2   :  { %v54_v3 = vadd.f32 %v401_v1, %v396_v0  ;;  %v413_v4 = vld [vmem:[%s767_s0 + $0x60] sm:$0xff]  ;;  %v418_v5 = vld [vmem:[%s767_s0 + $0x68] sm:$0xff]  ;;  %v423_v6 = vld [vmem:[%s767_s0 + $0x58] sm:$0xff]  ;;  %375 = vset.pattern.permute.xlu2 %v381_v29 }
   0x3   :  { %v8_v7 = vld [vmem:[%s767_s0] sm:$0xff]  ;;  %v62_v9 = vadd.f32 %v418_v5, %v413_v4  ;;  %v9_v10 = vld [vmem:[%s767_s0 + $0x8] sm:$0xff]  ;;  %v10_v11 = vld [vmem:[%s767_s0 + $0x10] sm:$0xff] }
   0x4   :  { %v55_v8 = vadd.f32 %v406_v2, %v54_v3  ;;  %v440_v12 = vld [vmem:[%s767_s0 + $0x70] sm:$0xff]  ;;  %v31_v13 = vadd.f32 %v9_v10, %v8_v7  ;;  %v312_v14 = vld [vmem:[%s767_s0 + $0x20] sm:$0xff]  ;;  %v313_v15 = vld [vmem:[%s767_s0 + $0x28] sm:$0xff] }
   0x5   :  { %v11_v17 = vld [vmem:[%s767_s0 + $0x18] sm:$0xff]  ;;  %v46_v19 = vadd.f32 %v313_v15, %v312_v14  ;;  %v63_v20 = vadd.f32 %v440_v12, %v62_v9  ;;  %v314_v21 = vld [vmem:[%s767_s0 + $0x30] sm:$0xff] }
   0x6   :  { %v56_v16 = vadd.f32 %v423_v6, %v55_v8  ;;  %v32_v18 = vadd.f32 %v31_v13, %v10_v11  ;;  %v459_v22 = vld [vmem:[%s767_s0 + $0x78] sm:$0xff] }
   0x7   :  { %v47_v24 = vadd.f32 %v314_v21, %v46_v19  ;;  %v64_v25 = vadd.f32 %v459_v22, %v63_v20  ;;  %v315_v26 = vld [vmem:[%s767_s0 + $0x38] sm:$0xff]  ;;  %v379_v30 = vpop.eup %378 }
   0x8   :  { %57 = vadd.xlane.f32.xlu1 %v56_v16  ;;  %v33_v23 = vadd.f32 %v32_v18, %v11_v17  ;;  %v37_v31 = vmul.f32 512.0, %v379_v30  ;;  %vm41_vm0 = vweird.f32 %v379_v30 }
   0x9   :  { %v48_v27 = vadd.f32 %v315_v26, %v47_v24 }
   0xa   :  { %34 = vadd.xlane.f32.xlu0 %v33_v23  ;;  %v38_v32 = vsub.f32 1.0, %v37_v31 }
   0xc   :  { %v39_v33 = vmul.f32 %v379_v30, %v38_v32 }
   0xe   :  { %v40_v34 = vadd.f32 %v379_v30, %v39_v33 }
  0x10   :  { %65 = vadd.xlane.f32.xlu1 %v64_v25  ;;  %v42_v35 = vsel %vm41_vm0, %v379_v30, %v40_v34 }
  0x12   :  { %49 = vadd.xlane.f32.xlu0 %v48_v27 }
  0x7b   :  { %v58_v36 = vpop.xlane.xlu1 %57 }
  0x7c   :  { %v59_v37 = vmul.f32 %v58_v36, %v42_v35 }
  0x7d   :  { %v35_v38 = vpop.xlane.xlu0 %34 }
  0x7e   :  { %325 = vst.msk [vmem:[%s768_s1 + $0x10] sm:$0xff] %vm44_vm1, %v59_v37  ;;  %v43_v39 = vmul.f32 %v42_v35, %v35_v38 }
  0x80   :  { %45 = vst.msk [vmem:[%s768_s1] sm:$0xff] %vm44_vm1, %v43_v39 }
  0x83   :  { %v66_v40 = vpop.xlane.xlu1 %65 }
  0x84   :  { %v67_v41 = vmul.f32 %v66_v40, %v42_v35 }
  0x85   :  { %v342_v42 = vld [vmem:[%s768_s1 + $0x10] sm:$0xff]  ;;  %v50_v43 = vpop.xlane.xlu0 %49 }
  0x86   :  { %326 = vst.msk [vmem:[%s768_s1 + $0x18] sm:$0xff] %vm44_vm1, %v67_v41  ;;  %123 = vperm.xlu0 %376, %v342_v42   ;;  %v51_v44 = vmul.f32 %v50_v43, %v42_v35 }
  0x87   :  { %v98_v45 = vld [vmem:[%s768_s1] sm:$0xff] }
  0x88   :  { %324 = vst.msk [vmem:[%s768_s1 + $0x8] sm:$0xff] %vm44_vm1, %v51_v44  ;;  %101 = vperm.xlu2 %375, %v98_v45  }
  0x8d   :  { %v343_v46 = vld [vmem:[%s768_s1 + $0x18] sm:$0xff] }
  0x8e   :  { %134 = vperm.xlu1 %377, %v343_v46  }
  0x8f   :  { %v341_v47 = vld [vmem:[%s768_s1 + $0x8] sm:$0xff] }
  0x90   :  { %112 = vperm.xlu2 %375, %v341_v47  }
  0xe2   :  { %v102_v48 = vpop.permute.xlu2 %101 }
  0xe3   :  { %v493_v49 = vsub.f32 %v8_v7, %v102_v48  ;;  %v495_v50 = vsub.f32 %v9_v10, %v102_v48  ;;  %v497_v51 = vsub.f32 %v10_v11, %v102_v48  ;;  %v499_v52 = vsub.f32 %v11_v17, %v102_v48 }
  0xe5   :  { %v143_v53 = vadd.f32 %v495_v50, %v493_v49  ;;  %v180_v20 = vmul.f32 %v493_v49, %v493_v49  ;;  %v182_v29 = vmul.f32 %v497_v51, %v497_v51  ;;  %v183_v37 = vmul.f32 %v499_v52, %v499_v52 }
  0xe7   :  { %v144_v54 = vadd.f32 %v143_v53, %v497_v51 }
  0xe9   :  { %v145_v55 = vadd.f32 %v144_v54, %v499_v52 }
  0xea   :  { %v113_v56 = vpop.permute.xlu2 %112 }
  0xeb   :  { %v505_v57 = vsub.f32 %v312_v14, %v113_v56  ;;  %v507_v58 = vsub.f32 %v313_v15, %v113_v56  ;;  %v509_v59 = vsub.f32 %v314_v21, %v113_v56  ;;  %146 = vadd.xlane.f32.xlu2 %v145_v55  ;;  %v511_v60 = vsub.f32 %v315_v26, %v113_v56 }
  0xec   :  { %v181_v21 = vmul.f32 %v495_v50, %v495_v50 }
  0xed   :  { %v153_v61 = vadd.f32 %v507_v58, %v505_v57  ;;  %v193_v40 = vmul.f32 %v505_v57, %v493_v49  ;;  %v194_v41 = vmul.f32 %v507_v58, %v495_v50  ;;  %v195_v47 = vmul.f32 %v509_v59, %v497_v51 }
  0xee   :  { %v184_v30 = vadd.f32 %v181_v21, %v180_v20  ;;  %v196_v55 = vmul.f32 %v511_v60, %v499_v52 }
  0xef   :  { %v154_v62 = vadd.f32 %v153_v61, %v509_v59  ;;  %v197_v48 = vadd.f32 %v194_v41, %v193_v40 }
  0xf0   :  { %v185_v38 = vadd.f32 %v184_v30, %v182_v29 }
  0xf1   :  { %v155_v63 = vadd.f32 %v154_v62, %v511_v60  ;;  %v198_v56 = vadd.f32 %v197_v48, %v195_v47 }
  0xf2   :  { %v186_v45 = vadd.f32 %v185_v38, %v183_v37 }
  0xf3   :  { %156 = vadd.xlane.f32.xlu1 %v155_v63 }
  0xf8   :  { %v124_v3 = vpop.permute.xlu0 %123 }
  0xf9   :  { %v126_v7 = vsub.f32 %v396_v0, %v124_v3  ;;  %v127_v8 = vsub.f32 %v401_v1, %v124_v3  ;;  %v520_v9 = vsub.f32 %v406_v2, %v124_v3  ;;  %v523_v14 = vsub.f32 %v423_v6, %v124_v3 }
  0xfb   :  { %v162_v10 = vadd.f32 %v127_v8, %v126_v7  ;;  %v271_v11 = vmul.f32 %v126_v7, %v126_v7  ;;  %v272_v13 = vmul.f32 %v127_v8, %v127_v8  ;;  %v273_v0 = vmul.f32 %v520_v9, %v520_v9 }
  0xfc   :  { %v274_v24 = vmul.f32 %v523_v14, %v523_v14  ;;  %v245_v25 = vmul.f32 %v126_v7, %v505_v57  ;;  %v246_v28 = vmul.f32 %v127_v8, %v507_v58  ;;  %v247_v39 = vmul.f32 %v520_v9, %v509_v59 }
  0xfd   :  { %v163_v15 = vadd.f32 %v162_v10, %v520_v9  ;;  %v275_v16 = vadd.f32 %v272_v13, %v271_v11  ;;  %v248_v46 = vmul.f32 %v523_v14, %v511_v60  ;;  %v206_v62 = vmul.f32 %v126_v7, %v493_v49 }
  0xfe   :  { %v249_v36 = vadd.f32 %v246_v28, %v245_v25  ;;  %v207_v63 = vmul.f32 %v127_v8, %v495_v50  ;;  %v199_v10 = vadd.f32 %v198_v56, %v196_v55 }
  0xff   :  { %v164_v17 = vadd.f32 %v163_v15, %v523_v14  ;;  %v276_v6 = vadd.f32 %v275_v16, %v273_v0  ;;  %v208_v16 = vmul.f32 %v520_v9, %v497_v51 }
 0x100   :  { %v135_v18 = vpop.permute.xlu1 %134  ;;  %v250_v42 = vadd.f32 %v249_v36, %v247_v39  ;;  %v210_v13 = vadd.f32 %v207_v63, %v206_v62 }
 0x101   :  { %v530_v1 = vsub.f32 %v413_v4, %v135_v18  ;;  %v533_v2 = vsub.f32 %v418_v5, %v135_v18  ;;  %v536_v19 = vsub.f32 %v440_v12, %v135_v18  ;;  %165 = vadd.xlane.f32.xlu0 %v164_v17  ;;  %v543_v23 = vsub.f32 %v459_v22, %v135_v18 }
 0x102   :  { %v277_v32 = vadd.f32 %v276_v6, %v274_v24  ;;  %v251_v53 = vadd.f32 %v250_v42, %v248_v46  ;;  %v382_v17 = vmov 0.0  }
 0x103   :  { %v171_v4 = vadd.f32 %v533_v2, %v530_v1  ;;  %v219_v5 = vmul.f32 %v530_v1, %v493_v49  ;;  %v220_v12 = vmul.f32 %v533_v2, %v495_v50  ;;  %v221_v22 = vmul.f32 %v536_v19, %v497_v51  ;;  %328 = vst.msk [vmem:[%s768_s1 + $0x28] sm:$0xff] %vm44_vm1, %v382_v17 }
 0x104   :  { %v222_v33 = vmul.f32 %v543_v23, %v499_v52  ;;  %v284_v43 = vmul.f32 %v530_v1, %v126_v7  ;;  %v285_v44 = vmul.f32 %v533_v2, %v127_v8  ;;  %v286_v61 = vmul.f32 %v536_v19, %v520_v9  ;;  %327 = vst.msk [vmem:[%s768_s1 + $0x20] sm:$0xff] %vm44_vm1, %v382_v17 }
 0x105   :  { %v172_v26 = vadd.f32 %v171_v4, %v536_v19  ;;  %v223_v27 = vadd.f32 %v220_v12, %v219_v5  ;;  %v287_v11 = vmul.f32 %v543_v23, %v523_v14  ;;  %v211_v49 = vadd.f32 %v210_v13, %v208_v16  ;;  %329 = vst.msk [vmem:[%s768_s1 + $0x30] sm:$0xff] %vm44_vm1, %v382_v17 }
 0x106   :  { %v288_v54 = vadd.f32 %v285_v44, %v284_v43  ;;  %v232_v50 = vmul.f32 %v505_v57, %v505_v57  ;;  %v233_v7 = vmul.f32 %v507_v58, %v507_v58  ;;  %v209_v51 = vmul.f32 %v523_v14, %v499_v52  ;;  %330 = vst.msk [vmem:[%s768_s1 + $0x38] sm:$0xff] %vm44_vm1, %v382_v17 }
 0x107   :  { %v173_v31 = vadd.f32 %v172_v26, %v543_v23  ;;  %v224_v34 = vadd.f32 %v223_v27, %v221_v22  ;;  %331 = vst.msk [vmem:[%s768_s1 + $0x40] sm:$0xff] %vm44_vm1, %v382_v17  ;;  %v234_v9 = vmul.f32 %v509_v59, %v509_v59  ;;  %v235_v52 = vmul.f32 %v511_v60, %v511_v60 }
 0x108   :  { %v289_v3 = vadd.f32 %v288_v54, %v286_v61  ;;  %v212_v8 = vadd.f32 %v211_v49, %v209_v51  ;;  %v236_v18 = vadd.f32 %v233_v7, %v232_v50  ;;  %332 = vst.msk [vmem:[%s768_s1 + $0x48] sm:$0xff] %vm44_vm1, %v382_v17  ;;  %v258_v0 = vmul.f32 %v530_v1, %v505_v57 }
 0x109   :  { %174 = vadd.xlane.f32.xlu2 %v173_v31  ;;  %278 = vadd.xlane.f32.xlu0 %v277_v32  ;;  %v225_v35 = vadd.f32 %v224_v34, %v222_v33  ;;  %333 = vst.msk [vmem:[%s768_s1 + $0x50] sm:$0xff] %vm44_vm1, %v382_v17  ;;  %v259_v6 = vmul.f32 %v533_v2, %v507_v58 }
 0x10a   :  { %v290_v15 = vadd.f32 %v289_v3, %v287_v11  ;;  %334 = vst.msk [vmem:[%s768_s1 + $0x58] sm:$0xff] %vm44_vm1, %v382_v17  ;;  %v237_v14 = vadd.f32 %v236_v18, %v234_v9  ;;  %v260_v20 = vmul.f32 %v536_v19, %v509_v59  ;;  %v297_v4 = vmul.f32 %v530_v1, %v530_v1 }
 0x10b   :  { %226 = vadd.xlane.f32.xlu1 %v225_v35  ;;  %335 = vst.msk [vmem:[%s768_s1 + $0x60] sm:$0xff] %vm44_vm1, %v382_v17  ;;  %v262_v58 = vadd.f32 %v259_v6, %v258_v0  ;;  %v298_v5 = vmul.f32 %v533_v2, %v533_v2  ;;  %v261_v12 = vmul.f32 %v543_v23, %v511_v60  ;;  %v344_v1 = vld [vmem:[%s768_s1 + $0x20] sm:$0xff]  ;;  %v346_v60 = vld [vmem:[%s768_s1 + $0x28] sm:$0xff] }
 0x10c   :  { %336 = vst.msk [vmem:[%s768_s1 + $0x68] sm:$0xff] %vm44_vm1, %v382_v17  ;;  %v238_v57 = vadd.f32 %v237_v14, %v235_v52  ;;  %v299_v26 = vmul.f32 %v536_v19, %v536_v19  ;;  %v300_v59 = vmul.f32 %v543_v23, %v543_v23  ;;  %v348_v23 = vld [vmem:[%s768_s1 + $0x30] sm:$0xff] }
 0x10d   :  { %337 = vst.msk [vmem:[%s768_s1 + $0x70] sm:$0xff] %vm44_vm1, %v382_v17  ;;  %v263_v21 = vadd.f32 %v262_v58, %v260_v20  ;;  %v301_v25 = vadd.f32 %v298_v5, %v297_v4  ;;  %v350_v32 = vld [vmem:[%s768_s1 + $0x38] sm:$0xff] }
 0x10e   :  { %338 = vst.msk [vmem:[%s768_s1 + $0x78] sm:$0xff] %vm44_vm1, %v382_v17  ;;  %v352_v41 = vld [vmem:[%s768_s1 + $0x40] sm:$0xff] }
 0x10f   :  { %339 = vst.msk [vmem:[%s768_s1 + $0x80] sm:$0xff] %vm44_vm1, %v382_v17  ;;  %v264_v24 = vadd.f32 %v263_v21, %v261_v12  ;;  %v302_v22 = vadd.f32 %v301_v25, %v299_v26  ;;  %v354_v47 = vld [vmem:[%s768_s1 + $0x48] sm:$0xff] }
 0x110   :  { %340 = vst.msk [vmem:[%s768_s1 + $0x88] sm:$0xff] %vm44_vm1, %v382_v17  ;;  %v356_v61 = vld [vmem:[%s768_s1 + $0x50] sm:$0xff] }
 0x111   :  { %187 = vadd.xlane.f32.xlu2 %v186_v45  ;;  %v303_v27 = vadd.f32 %v302_v22, %v300_v59  ;;  %v358_v36 = vld [vmem:[%s768_s1 + $0x58] sm:$0xff] }
 0x112   :  { %v360_v3 = vld [vmem:[%s768_s1 + $0x60] sm:$0xff] }
 0x113   :  { %252 = vadd.xlane.f32.xlu1 %v251_v53  ;;  %v362_v43 = vld [vmem:[%s768_s1 + $0x68] sm:$0xff] }
 0x114   :  { %v364_v13 = vld [vmem:[%s768_s1 + $0x70] sm:$0xff] }
 0x115   :  { %v366_v33 = vld [vmem:[%s768_s1 + $0x78] sm:$0xff] }
 0x116   :  { %v368_v53 = vld [vmem:[%s768_s1 + $0x80] sm:$0xff] }
 0x117   :  { %v370_v17 = vld [vmem:[%s768_s1 + $0x88] sm:$0xff] }
 0x119   :  { %200 = vadd.xlane.f32.xlu2 %v199_v10 }
 0x11b   :  { %291 = vadd.xlane.f32.xlu1 %v290_v15 }
 0x121   :  { %213 = vadd.xlane.f32.xlu2 %v212_v8 }
 0x129   :  { %239 = vadd.xlane.f32.xlu2 %v238_v57 }
 0x131   :  { %265 = vadd.xlane.f32.xlu2 %v264_v24 }
 0x139   :  { %304 = vadd.xlane.f32.xlu2 %v303_v27 }
 0x15e   :  { %v147_v2 = vpop.xlane.xlu2 %146 }
 0x15f   :  { %v148_v28 = vadd.f32 %v344_v1, %v147_v2 }
 0x161   :  { %345 = vst.msk [vmem:[%s768_s1 + $0x20] sm:$0xff] %vm44_vm1, %v148_v28 }
 0x166   :  { %v157_v19 = vpop.xlane.xlu1 %156 }
 0x167   :  { %v158_v29 = vadd.f32 %v346_v60, %v157_v19 }
 0x169   :  { %347 = vst.msk [vmem:[%s768_s1 + $0x28] sm:$0xff] %vm44_vm1, %v158_v29 }
 0x174   :  { %v166_v30 = vpop.xlane.xlu0 %165 }
 0x175   :  { %v167_v31 = vadd.f32 %v348_v23, %v166_v30 }
 0x177   :  { %349 = vst.msk [vmem:[%s768_s1 + $0x30] sm:$0xff] %vm44_vm1, %v167_v31 }
 0x17c   :  { %v175_v34 = vpop.xlane.xlu2 %174  ;;  %v279_v35 = vpop.xlane.xlu0 %278 }
 0x17d   :  { %v176_v37 = vadd.f32 %v350_v32, %v175_v34  ;;  %v280_v38 = vadd.f32 %v366_v33, %v279_v35 }
 0x17e   :  { %v227_v39 = vpop.xlane.xlu1 %226 }
 0x17f   :  { %351 = vst.msk [vmem:[%s768_s1 + $0x38] sm:$0xff] %vm44_vm1, %v176_v37  ;;  %v228_v40 = vadd.f32 %v358_v36, %v227_v39 }
 0x180   :  { %367 = vst.msk [vmem:[%s768_s1 + $0x78] sm:$0xff] %vm44_vm1, %v280_v38 }
 0x181   :  { %359 = vst.msk [vmem:[%s768_s1 + $0x58] sm:$0xff] %vm44_vm1, %v228_v40 }
 0x184   :  { %v188_v42 = vpop.xlane.xlu2 %187 }
 0x185   :  { %v189_v44 = vadd.f32 %v352_v41, %v188_v42 }
 0x186   :  { %v253_v45 = vpop.xlane.xlu1 %252 }
 0x187   :  { %353 = vst.msk [vmem:[%s768_s1 + $0x40] sm:$0xff] %vm44_vm1, %v189_v44  ;;  %v254_v46 = vadd.f32 %v362_v43, %v253_v45 }
 0x189   :  { %363 = vst.msk [vmem:[%s768_s1 + $0x68] sm:$0xff] %vm44_vm1, %v254_v46 }
 0x18c   :  { %v201_v48 = vpop.xlane.xlu2 %200 }
 0x18d   :  { %v202_v54 = vadd.f32 %v354_v47, %v201_v48 }
 0x18e   :  { %v292_v55 = vpop.xlane.xlu1 %291 }
 0x18f   :  { %355 = vst.msk [vmem:[%s768_s1 + $0x48] sm:$0xff] %vm44_vm1, %v202_v54  ;;  %v293_v56 = vadd.f32 %v368_v53, %v292_v55 }
 0x191   :  { %369 = vst.msk [vmem:[%s768_s1 + $0x80] sm:$0xff] %vm44_vm1, %v293_v56 }
 0x194   :  { %v214_v62 = vpop.xlane.xlu2 %213 }
 0x195   :  { %v215_v63 = vadd.f32 %v356_v61, %v214_v62 }
 0x197   :  { %357 = vst.msk [vmem:[%s768_s1 + $0x50] sm:$0xff] %vm44_vm1, %v215_v63 }
 0x19c   :  { %v240_v10 = vpop.xlane.xlu2 %239 }
 0x19d   :  { %v241_v11 = vadd.f32 %v360_v3, %v240_v10 }
 0x19f   :  { %361 = vst.msk [vmem:[%s768_s1 + $0x60] sm:$0xff] %vm44_vm1, %v241_v11 }
 0x1a4   :  { %v266_v15 = vpop.xlane.xlu2 %265 }
 0x1a5   :  { %v267_v16 = vadd.f32 %v364_v13, %v266_v15 }
 0x1a7   :  { %365 = vst.msk [vmem:[%s768_s1 + $0x70] sm:$0xff] %vm44_vm1, %v267_v16 }
 0x1ac   :  { %v305_v49 = vpop.xlane.xlu2 %304 }
 0x1ad   :  { %v306_v50 = vadd.f32 %v370_v17, %v305_v49 }
 0x1af   :  { %371 = vst.msk [vmem:[%s768_s1 + $0x88] sm:$0xff] %vm44_vm1, %v306_v50 }

// kernel: custom-call.4
= control target key start
LH: loop header
LB: loop body
LE: loop exit
PB: predicated region body
PF: predicated region fallthrough
CT: control target
= control target key end

     0   :  { %s407_s6 = smov 0   ;;  %s409_s7 = smov 0   ;;  %s460_s0 = inlined_call_operand.vmem [shape: f32[8,4,4], index: 0, kind: input, shape index: {}]   ;;  %s461_s1 = inlined_call_operand.vmem [shape: f32[8,4,4], index: 1, kind: output, shape index: {}]  }
   0x1   :  { %s411_s8 = smov 0  }
   0x2 LB: > { %s327_s9 = sadd.s32 4294967295, %s394_s8   ;;  %s26_s10 = sadd.s32 1, %s390_s7  ;;  %s394_s8 = sphi %s411_s8, %s7_s8   ;;  %s390_s7 = sphi %s409_s7, %s463_s7   ;;  %s386_s6 = sphi %s407_s6, %s462_s6  }
   0x3   : > { %p28_p0 = scmp.ge.s32.totalorder %s26_s10, 8  ;;  %p329_p1 = scmp.ge.s32.totalorder %s394_s8, 8 }
   0x4   : > { %s42_s11 = sand.u32 (!%p329_p1), 1, %s394_s8   ;;  %s331_s12 = sshll.u32 (!%p329_p1), %s390_s7, 2 }
   0x5   : > { %s465_s10 = smov (%p28_p0, %s26_s10), 0  ;;  %40 = sbr.rel (%p329_p1) target bundleno = 12 (0xc), region = 16 }
   0x6   : > { %s330_s13 = sshll.u32 (!%p329_p1), %s42_s11, 2  ;;  %s48_s16 = scalar_lea.vmem (!%p329_p1), %s460_s0, %s331_s12 }
   0x7   : > { %s44_s17 = scalar_lea.vmem (!%p329_p1), [#allocation1], %s330_s13 }
   0xa   : > { %v65_v0 = vld [vmem:[%s48_s16] sm:$0xf] }
   0xb   : > { %66 = vst [vmem:[%s44_s17] sm:$0xf] %v65_v0 }
   0xc PF: > { %p332_p2 = scmp.ge.s32.totalorder %s394_s8, 1  ;;  %p83_p3 = scmp.lt.s32.totalorder %s394_s8, 9 }
   0xe   : > { %p84_p4 = pnand %p332_p2, %p83_p3 }
   0xf   : > { %s434_s18 = sand.u32 (!%p84_p4), 1, %s327_s9   ;;  %s336_s22 = sshll.u32 (!%p84_p4), %s386_s6, 2 }
  0x10   : > { %87 = sbr.rel (%p84_p4) target bundleno = 641 (0x281), region = 50  ;;  %s333_s19 = sshll.u32 (!%p84_p4), %s434_s18, 2 }
  0x11   : > { %s96_s20 = scalar_lea.vmem (!%p84_p4), [#allocation1], %s333_s19  ;;  %s100_s21 = scalar_lea.vmem (!%p84_p4), [#allocation3], %s333_s19 }
  0x12   : > { %s239_s25 = scalar_lea.vmem (!%p84_p4), %s461_s1, %s336_s22 }
  0x15   : > { %v396_v1 = vmov 0.0   ;;  %v103_v5 = vld [vmem:[%s96_s20] sm:$0xf]  ;;  %vm106_vm3 = vcmask 7168   ;;  %vm133_vm5 = vcmask 15368   ;;  %vm159_vm6 = vcmask 1047553  }
  0x16   : > { %105 = vst [vmem:[#allocation2] sm:$0xff] %v396_v1  ;;  %vm160_vm9 = vmand %vm133_vm5, %vm159_vm6  ;;  %vm164_vm11 = vcmask 23568   ;;  %vm190_vm12 = vcmask 1047554  }
  0x17   : > { %104 = vst [vmem:[#allocation0] sm:$0xf] %v103_v5  ;;  %vm191_vm15 = vmand %vm164_vm11, %vm190_vm12 }
  0x1d   : > { %v107_v2 = vld [vmem:[#allocation2] ss:$0 sm:$0xff] }
  0x1e   : > { %v109_v3 = vmul.f32 %v107_v2, %v107_v2  ;;  %v125_v4 = vmul.f32 0.0, %v107_v2  ;;  %v108_v6 = vld [vmem:[#allocation0] ss:$0 sm:$0xff]  ;;  %v137_v24 = vld [vmem:[#allocation0 + $0x1] ss:$0 sm:$0xff] }
  0x1f   : > { %v439_v14 = vld [vmem:[#allocation0] sm:$0xff] }
  0x20   : > { %110 = vadd.xlane.f32.xlu0 %v109_v3  ;;  %v168_v42 = vld [vmem:[#allocation0 + $0x2] ss:$0 sm:$0xff]  ;;  %v199_v60 = vld [vmem:[#allocation0 + $0x3] ss:$0 sm:$0xff] }
  0x28   : > { %126 = vadd.xlane.f32.xlu0 %v125_v4 }
  0x93   : > { %v111_v7 = vpop.xlane.xlu0 %110 }
  0x94   : > { %v112_v8 = vsub.f32 %v108_v6, %v111_v7 }
  0x96   : > { %364 = vrsqrt.f32 %v112_v8  ;;  %vm119_vm1 = vweird.f32 %v112_v8 }
  0x9b   : > { %v127_v13 = vpop.xlane.xlu0 %126 }
  0x9c   : > { %v365_v9 = vpop.eup %364  ;;  %v128_v16 = vsub.f32 %v439_v14, %v127_v13 }
  0x9d   : > { %v114_v10 = vmul.f32 %v365_v9, %v112_v8  ;;  %vm120_vm0 = vweird.f32 %v365_v9 }
  0x9e   : > { %vm121_vm2 = vmor %vm119_vm1, %vm120_vm0  ;;  %vm195_vm1 = vcmask 31768  }
  0x9f   : > { %v115_v11 = vmul.f32 %v365_v9, %v114_v10 }
  0xa1   : > { %v116_v12 = vmul.f32 0.5, %v115_v11 }
  0xa3   : > { %v117_v15 = vsub.f32 1.5, %v116_v12 }
  0xa5   : > { %v118_v17 = vmul.f32 %v365_v9, %v117_v15 }
  0xa7   : > { %v122_v18 = vsel %vm121_vm2, %v365_v9, %v118_v17  ;;  %vm221_vm2 = vcmask 1047555  }
  0xa8   : > { %v129_v19 = vmul.f32 %v128_v16, %v122_v18  ;;  %vm222_vm5 = vmand %vm195_vm1, %vm221_vm2 }
  0xaa   : > { %v130_v20 = vsel %vm106_vm3, %v129_v19, 0.0 }
  0xab   : > { %132 = vst [vmem:[#allocation2] sm:$0xff] %v130_v20 }
  0xb2   : > { %v135_v21 = vld [vmem:[#allocation2 + $0x1] ss:$0 sm:$0xff] }
  0xb3   : > { %v138_v22 = vmul.f32 %v135_v21, %v135_v21  ;;  %v154_v23 = vmul.f32 %v135_v21, %v130_v20 }
  0xb5   : > { %139 = vadd.xlane.f32.xlu1 %v138_v22 }
  0xbd   : > { %155 = vadd.xlane.f32.xlu1 %v154_v23 }
 0x128   : > { %v140_v25 = vpop.xlane.xlu1 %139 }
 0x129   : > { %v141_v26 = vsub.f32 %v137_v24, %v140_v25 }
 0x12b   : > { %366 = vrsqrt.f32 %v141_v26  ;;  %vm148_vm7 = vweird.f32 %v141_v26 }
 0x130   : > { %v156_v32 = vpop.xlane.xlu1 %155 }
 0x131   : > { %v367_v27 = vpop.eup %366  ;;  %v157_v34 = vsub.f32 %v439_v14, %v156_v32 }
 0x132   : > { %v143_v28 = vmul.f32 %v367_v27, %v141_v26  ;;  %vm149_vm4 = vweird.f32 %v367_v27 }
 0x133   : > { %vm150_vm8 = vmor %vm148_vm7, %vm149_vm4 }
 0x134   : > { %v144_v29 = vmul.f32 %v367_v27, %v143_v28 }
 0x136   : > { %v145_v30 = vmul.f32 0.5, %v144_v29 }
 0x138   : > { %v146_v31 = vsub.f32 1.5, %v145_v30 }
 0x13a   : > { %v147_v33 = vmul.f32 %v367_v27, %v146_v31 }
 0x13c   : > { %v151_v35 = vsel %vm150_vm8, %v367_v27, %v147_v33 }
 0x13d   : > { %v158_v36 = vmul.f32 %v157_v34, %v151_v35 }
 0x13f   : > { %v161_v37 = vsel %vm160_vm9, %v158_v36, 0.0 }
 0x140   : > { %v162_v38 = vadd.f32 %v161_v37, %v130_v20 }
 0x142   : > { %163 = vst [vmem:[#allocation2] sm:$0xff] %v162_v38 }
 0x149   : > { %v166_v39 = vld [vmem:[#allocation2 + $0x2] ss:$0 sm:$0xff] }
 0x14a   : > { %v169_v40 = vmul.f32 %v166_v39, %v166_v39  ;;  %v185_v41 = vmul.f32 %v166_v39, %v162_v38 }
 0x14c   : > { %170 = vadd.xlane.f32.xlu2 %v169_v40 }
 0x154   : > { %186 = vadd.xlane.f32.xlu2 %v185_v41 }
 0x1bf   : > { %v171_v43 = vpop.xlane.xlu2 %170 }
 0x1c0   : > { %v172_v44 = vsub.f32 %v168_v42, %v171_v43 }
 0x1c2   : > { %368 = vrsqrt.f32 %v172_v44  ;;  %vm179_vm13 = vweird.f32 %v172_v44 }
 0x1c7   : > { %v187_v50 = vpop.xlane.xlu2 %186 }
 0x1c8   : > { %v369_v45 = vpop.eup %368  ;;  %v188_v52 = vsub.f32 %v439_v14, %v187_v50 }
 0x1c9   : > { %v174_v46 = vmul.f32 %v369_v45, %v172_v44  ;;  %vm180_vm10 = vweird.f32 %v369_v45 }
 0x1ca   : > { %vm181_vm14 = vmor %vm179_vm13, %vm180_vm10 }
 0x1cb   : > { %v175_v47 = vmul.f32 %v369_v45, %v174_v46 }
 0x1cd   : > { %v176_v48 = vmul.f32 0.5, %v175_v47 }
 0x1cf   : > { %v177_v49 = vsub.f32 1.5, %v176_v48 }
 0x1d1   : > { %v178_v51 = vmul.f32 %v369_v45, %v177_v49 }
 0x1d3   : > { %v182_v53 = vsel %vm181_vm14, %v369_v45, %v178_v51 }
 0x1d4   : > { %v189_v54 = vmul.f32 %v188_v52, %v182_v53 }
 0x1d6   : > { %v192_v55 = vsel %vm191_vm15, %v189_v54, 0.0 }
 0x1d7   : > { %v193_v56 = vadd.f32 %v192_v55, %v162_v38 }
 0x1d9   : > { %194 = vst [vmem:[#allocation2] sm:$0xff] %v193_v56 }
 0x1e0   : > { %v197_v57 = vld [vmem:[#allocation2 + $0x3] ss:$0 sm:$0xff] }
 0x1e1   : > { %v216_v58 = vmul.f32 %v197_v57, %v193_v56  ;;  %v200_v59 = vmul.f32 %v197_v57, %v197_v57 }
 0x1e3   : > { %217 = vadd.xlane.f32.xlu1 %v216_v58  ;;  %201 = vadd.xlane.f32.xlu0 %v200_v59 }
 0x256   : > { %v202_v61 = vpop.xlane.xlu0 %201  ;;  %v218_v3 = vpop.xlane.xlu1 %217 }
 0x257   : > { %v203_v62 = vsub.f32 %v199_v60, %v202_v61  ;;  %v219_v6 = vsub.f32 %v439_v14, %v218_v3 }
 0x259   : > { %370 = vrsqrt.f32 %v203_v62  ;;  %vm210_vm3 = vweird.f32 %v203_v62 }
 0x25f   : > { %v371_v63 = vpop.eup %370 }
 0x260   : > { %v205_v0 = vmul.f32 %v371_v63, %v203_v62  ;;  %vm211_vm0 = vweird.f32 %v371_v63 }
 0x261   : > { %vm212_vm4 = vmor %vm210_vm3, %vm211_vm0 }
 0x262   : > { %v206_v1 = vmul.f32 %v371_v63, %v205_v0 }
 0x264   : > { %v207_v2 = vmul.f32 0.5, %v206_v1 }
 0x266   : > { %v208_v4 = vsub.f32 1.5, %v207_v2 }
 0x268   : > { %v209_v5 = vmul.f32 %v371_v63, %v208_v4 }
 0x26a   : > { %v213_v7 = vsel %vm212_vm4, %v371_v63, %v209_v5 }
 0x26b   : > { %v220_v8 = vmul.f32 %v219_v6, %v213_v7 }
 0x26d   : > { %v223_v9 = vsel %vm222_vm5, %v220_v8, 0.0 }
 0x26e   : > { %v224_v10 = vadd.f32 %v223_v9, %v193_v56 }
 0x270   : > { %225 = vst [vmem:[#allocation2] sm:$0xff] %v224_v10 }
 0x277   : > { %v228_v11 = vld [vmem:[#allocation2] sm:$0xf] }
 0x278   : > { %231 = vst [vmem:[%s100_s21] sm:$0xf] %v228_v11 }
 0x27f   : > { %v256_v12 = vld [vmem:[%s100_s21] sm:$0xf] }
 0x280   : > { %257 = vst [vmem:[%s239_s25] sm:$0xf] %v256_v12 }
 0x281 PF: > { %s7_s8 = sadd.s32 1, %s394_s8   ;;  %s462_s6 = smov %s390_s7 }
 0x282   : > { %p4_p5 = scmp.ge.s32.totalorder %s7_s8, 10   ;;  %s463_s7 = smov %s465_s10 }
 0x284   :  { %6 = sbr.rel (!%p4_p5) target bundleno = 2 (0x2), region = 116 }

// kernel: custom-call.5
= control target key start
LH: loop header
LB: loop body
LE: loop exit
PB: predicated region body
PF: predicated region fallthrough
CT: control target
= control target key end

     0   :  { %s382_s6 = smov 0   ;;  %s384_s7 = smov 0   ;;  %s431_s0 = inlined_call_operand.vmem [shape: f32[8,1,4,4], index: 0, kind: input, shape index: {}]   ;;  %s432_s1 = inlined_call_operand.vmem [shape: f32[8,1,4,4], index: 1, kind: output, shape index: {}]  }
   0x1   :  { %s386_s8 = smov 0  }
   0x2 LB: > { %s308_s9 = sadd.s32 4294967295, %s369_s8   ;;  %s33_s10 = sadd.s32 1, %s365_s7  ;;  %s369_s8 = sphi %s386_s8, %s7_s8   ;;  %s365_s7 = sphi %s384_s7, %s434_s7   ;;  %s361_s6 = sphi %s382_s6, %s433_s6  }
   0x3   : > { %p35_p0 = scmp.ge.s32.totalorder %s33_s10, 8  ;;  %p310_p1 = scmp.ge.s32.totalorder %s369_s8, 8 }
   0x4   : > { %s49_s11 = sand.u32 (!%p310_p1), 1, %s369_s8   ;;  %s312_s12 = sshll.u32 (!%p310_p1), %s365_s7, 2 }
   0x5   : > { %s436_s10 = smov (%p35_p0, %s33_s10), 0  ;;  %47 = sbr.rel (%p310_p1) target bundleno = 12 (0xc), region = 16 }
   0x6   : > { %s311_s13 = sshll.u32 (!%p310_p1), %s49_s11, 2  ;;  %s56_s16 = scalar_lea.vmem (!%p310_p1), %s431_s0, %s312_s12 }
   0x7   : > { %s51_s17 = scalar_lea.vmem (!%p310_p1), [#allocation1], %s311_s13 }
   0xa   : > { %v73_v0 = vld [vmem:[%s56_s16] sm:$0xf] }
   0xb   : > { %74 = vst [vmem:[%s51_s17] sm:$0xf] %v73_v0 }
   0xc PF: > { %p313_p2 = scmp.ge.s32.totalorder %s369_s8, 1  ;;  %p91_p3 = scmp.lt.s32.totalorder %s369_s8, 9 }
   0xe   : > { %p92_p4 = pnand %p313_p2, %p91_p3 }
  0x10   : > { %95 = sbr.rel (%p92_p4) target bundleno = 556 (0x22c), region = 50 }
  0x15   : > { %s409_s18 = sand.u32 1, %s308_s9   ;;  %v113_v1 = vlaneseq  ;;  %v371_v20 = vmov -1.0   ;;  %s317_s22 = sshll.u32 %s361_s6, 2 }
  0x16   : > { %s314_s19 = sshll.u32 %s409_s18, 2  ;;  %s215_s25 = scalar_lea.vmem %s432_s1, %s317_s22 }
  0x17   : > { %s104_s20 = scalar_lea.vmem [#allocation1], %s314_s19  ;;  %v114_v3 = vand.u32 127, %v113_v1  ;;  %v117_v4 = vshrl.u32 %v113_v1, 7  ;;  %s108_s21 = scalar_lea.vmem [#allocation3], %s314_s19 }
  0x18   : > { %v111_v2 = vld [vmem:[%s104_s20] sm:$0xf] }
  0x19   : > { %112 = vst [vmem:[#allocation0] sm:$0xf] %v111_v2  ;;  %vm119_vm0 = vcmp.eq.s32.totalorder %v117_v4, %v114_v3  ;;  %vm115_vm1 = vcmp.lt.s32.totalorder %v114_v3, 4  ;;  %vm124_vm2 = vcmp.le.s32.totalorder %v117_v4, %v114_v3  ;;  %vm151_vm8 = vcmp.eq.s32.totalorder %v114_v3, 3 }
  0x1a   : > { %vm125_vm3 = vmand %vm124_vm2, %vm115_vm1  ;;  %vm148_vm9 = vcmp.eq.s32.totalorder %v114_v3, %v117_v4  ;;  %v152_v21 = vsel %vm151_vm8, 1.0, %v371_v20  ;;  %vm159_vm10 = vcmp.eq.s32.totalorder %v114_v3, 2  ;;  %vm169_vm11 = vcmp.eq.s32.totalorder %v114_v3, 1 }
  0x1b   : > { %v153_v22 = vsel %vm148_vm9, %v152_v21, 0.0  ;;  %vm178_vm12 = vcmp.eq.s32.totalorder %v114_v3, 0 }
  0x20   : > { %v120_v5 = vld [vmem:[#allocation0] sm:$0xff] }
  0x21   : > { %v121_v6 = vsel %vm119_vm0, %v120_v5, 0.0  ;;  %v126_v15 = vsel %vm125_vm3, %v120_v5, 0.0 }
  0x22   : > { %122 = vadd.xlane.f32.xlu0 %v121_v6 }
  0x95   : > { %v123_v7 = vpop.xlane.xlu0 %122 }
  0x96   : > { %345 = vrcp.f32 %v123_v7  ;;  %v138_v11 = vand.u32 2147483648, %v123_v7  ;;  %v136_v13 = vand.u32 2147483647, %v123_v7  ;;  %vm132_vm5 = vweird.f32 %v123_v7 }
  0x98   : > { %v139_v16 = vor.u32 1.1754944e-38, %v138_v11  ;;  %vm137_vm7 = vcmp.eq.f32.partialorder %v136_v13, 8.507059e+37 }
  0x9c   : > { %v346_v8 = vpop.eup %345 }
  0x9d   : > { %v128_v9 = vmul.f32 %v346_v8, %v123_v7  ;;  %vm133_vm4 = vweird.f32 %v346_v8 }
  0x9e   : > { %vm134_vm6 = vmor %vm132_vm5, %vm133_vm4 }
  0x9f   : > { %v129_v10 = vsub.f32 1.0, %v128_v9 }
  0xa1   : > { %v130_v12 = vmul.f32 %v346_v8, %v129_v10 }
  0xa3   : > { %v131_v14 = vadd.f32 %v346_v8, %v130_v12 }
  0xa5   : > { %v135_v17 = vsel %vm134_vm6, %v346_v8, %v131_v14 }
  0xa6   : > { %v140_v18 = vsel %vm137_vm7, %v139_v16, %v135_v17 }
  0xa7   : > { %v141_v19 = vmul.f32 %v140_v18, %v126_v15 }
  0xa9   : > { %142 = vst [vmem:[#allocation4] sm:$0xff] %v141_v19 }
  0xb0   : > { %v155_v23 = vld [vmem:[#allocation4 + $0x2] ss:$0 sm:$0xff]  ;;  %v165_v26 = vld [vmem:[#allocation4 + $0x1] ss:$0 sm:$0xff]  ;;  %v174_v31 = vld [vmem:[#allocation4] ss:$0 sm:$0xff] }
  0xb1   : > { %v156_v24 = vxor.u32 2147483648, %v155_v23  ;;  %v166_v28 = vxor.u32 2147483648, %v165_v26  ;;  %v175_v33 = vxor.u32 2147483648, %v174_v31 }
  0xb3   : > { %v160_v25 = vmul.f32 %v156_v24, %v153_v22 }
  0xb5   : > { %161 = vadd.xlane.f32.xlu0 %v160_v25 }
 0x128   : > { %v162_v27 = vpop.xlane.xlu0 %161 }
 0x129   : > { %v163_v29 = vsel %vm159_vm10, %v162_v27, %v153_v22 }
 0x12a   : > { %v170_v30 = vmul.f32 %v166_v28, %v163_v29 }
 0x12c   : > { %171 = vadd.xlane.f32.xlu1 %v170_v30 }
 0x19f   : > { %v172_v32 = vpop.xlane.xlu1 %171 }
 0x1a0   : > { %v173_v34 = vsel %vm169_vm11, %v172_v32, %v163_v29 }
 0x1a1   : > { %v179_v35 = vmul.f32 %v175_v33, %v173_v34 }
 0x1a3   : > { %180 = vadd.xlane.f32.xlu1 %v179_v35 }
 0x216   : > { %v181_v36 = vpop.xlane.xlu1 %180 }
 0x217   : > { %v182_v37 = vsel %vm178_vm12, %v181_v36, %v173_v34 }
 0x218   : > { %v197_v38 = vmul.f32 %v182_v37, %v140_v18 }
 0x21a   : > { %v199_v39 = vsel %vm132_vm5, %v182_v37, %v197_v38 }
 0x21b   : > { %200 = vst [vmem:[#allocation2] sm:$0xff] %v199_v39 }
 0x222   : > { %v203_v40 = vld [vmem:[#allocation2] sm:$0xf] }
 0x223   : > { %206 = vst [vmem:[%s108_s21] sm:$0xf] %v203_v40 }
 0x22a   : > { %v232_v41 = vld [vmem:[%s108_s21] sm:$0xf] }
 0x22b   : > { %233 = vst [vmem:[%s215_s25] sm:$0xf] %v232_v41 }
 0x22c PF: > { %s7_s8 = sadd.s32 1, %s369_s8   ;;  %s433_s6 = smov %s365_s7 }
 0x22d   : > { %p4_p5 = scmp.ge.s32.totalorder %s7_s8, 10   ;;  %s434_s7 = smov %s436_s10 }
 0x22f   :  { %6 = sbr.rel (!%p4_p5) target bundleno = 2 (0x2), region = 112 }

// kernel: sub.3
= control target key start
LH: loop header
LB: loop body
LE: loop exit
PB: predicated region body
PF: predicated region fallthrough
CT: control target
= control target key end

     0   :  { %s34_s0 = inlined_call_operand.vmem [shape: f32[8,4], index: 0, kind: input, shape index: {}]   ;;  %s35_s1 = inlined_call_operand.vmem [shape: f32[8,4], index: 1, kind: input, shape index: {}]   ;;  %s36_s2 = inlined_call_operand.vmem [shape: f32[8,4], index: 2, kind: output, shape index: {}]  }
   0x1   :  { %v3_v0 = vld [vmem:[%s34_s0] sm:$0xff] }
   0x2   :  { %v4_v1 = vld [vmem:[%s35_s1] sm:$0xff] }
   0x3   :  { %v7_v2 = vsub.f32 %v3_v0, %v4_v1 }
   0x5   :  { %9 = vst [vmem:[%s36_s2] sm:$0xff] %v7_v2 }

// kernel: clifford_group_norm_pallas.3
= control target key start
LH: loop header
LB: loop body
LE: loop exit
PB: predicated region body
PF: predicated region fallthrough
CT: control target
= control target key end

     0   :  { %v367_v0 = vmov 0   ;;  %s647_s0 = inlined_call_operand.vmem [shape: f32[20,8,1], index: 0, kind: input, shape index: {}]   ;;  %s648_s1 = inlined_call_operand.vmem [shape: f32[4,8,512], index: 1, kind: input, shape index: {}]   ;;  %s649_s2 = inlined_call_operand.vmem [shape: f32[4,8,512], index: 2, kind: output, shape index: {}]  }
   0x1   :  { %366 = vset.pattern.permute.xlu2 %v367_v0  ;;  %365 = vset.pattern.permute.xlu1 %v367_v0  ;;  %v335_v1 = vld [vmem:[%s647_s0 + $0x18] sm:$0xff]  ;;  %v333_v2 = vld [vmem:[%s647_s0 + $0x8] sm:$0xff]  ;;  %v32_v3 = vld [vmem:[%s647_s0] sm:$0xff] }
   0x2   :  { %364 = vset.pattern.permute.xlu0 %v367_v0  ;;  %85 = vperm.xlu2 %366, %v335_v1   ;;  %v337_v4 = vld [vmem:[%s647_s0 + $0x20] sm:$0xff]  ;;  %v334_v5 = vld [vmem:[%s647_s0 + $0x10] sm:$0xff]  ;;  %v338_v8 = vld [vmem:[%s647_s0 + $0x28] sm:$0xff] }
   0x3   :  { %55 = vperm.xlu1 %365, %v333_v2   ;;  %35 = vperm.xlu0 %364, %v32_v3   ;;  %v332_v6 = vld [vmem:[%s647_s0 + $0x80] sm:$0xff]  ;;  %v339_v7 = vld [vmem:[%s647_s0 + $0x30] sm:$0xff]  ;;  %v336_v9 = vld [vmem:[%s647_s0 + $0x88] sm:$0xff] }
   0x4   :  { %v345_v10 = vld [vmem:[%s647_s0 + $0x90] sm:$0xff]  ;;  %v346_v11 = vld [vmem:[%s647_s0 + $0x40] sm:$0xff]  ;;  %v340_v12 = vld [vmem:[%s647_s0 + $0x38] sm:$0xff] }
   0x5   :  { %v354_v13 = vld [vmem:[%s647_s0 + $0x98] sm:$0xff]  ;;  %v347_v14 = vld [vmem:[%s647_s0 + $0x48] sm:$0xff]  ;;  %v355_v15 = vld [vmem:[%s647_s0 + $0x60] sm:$0xff] }
   0x6   :  { %v357_v16 = vld [vmem:[%s647_s0 + $0x70] sm:$0xff]  ;;  %v356_v18 = vld [vmem:[%s647_s0 + $0x68] sm:$0xff]  ;;  %v358_v19 = vld [vmem:[%s647_s0 + $0x78] sm:$0xff] }
   0x7   :  { %v348_v17 = vld [vmem:[%s647_s0 + $0x50] sm:$0xff]  ;;  %v349_v20 = vld [vmem:[%s647_s0 + $0x58] sm:$0xff]  ;;  %v446_v25 = vld [vmem:[%s648_s1] sm:$0xff] }
   0x8   :  { %v451_v26 = vld [vmem:[%s648_s1 + $0x8] sm:$0xff]  ;;  %v456_v27 = vld [vmem:[%s648_s1 + $0x10] sm:$0xff]  ;;  %v461_v28 = vld [vmem:[%s648_s1 + $0x18] sm:$0xff] }
   0x9   :  { %v468_v30 = vld [vmem:[%s648_s1 + $0x20] sm:$0xff]  ;;  %v473_v31 = vld [vmem:[%s648_s1 + $0x28] sm:$0xff]  ;;  %v478_v32 = vld [vmem:[%s648_s1 + $0x30] sm:$0xff] }
   0xa   :  { %106 = vperm.xlu2 %366, %v337_v4   ;;  %v483_v33 = vld [vmem:[%s648_s1 + $0x38] sm:$0xff]  ;;  %v488_v34 = vld [vmem:[%s648_s1 + $0x60] sm:$0xff]  ;;  %v497_v41 = vld [vmem:[%s648_s1 + $0x68] sm:$0xff] }
   0xb   :  { %70 = vperm.xlu1 %365, %v334_v5   ;;  %44 = vperm.xlu0 %364, %v332_v6   ;;  %v502_v42 = vld [vmem:[%s648_s1 + $0x70] sm:$0xff]  ;;  %v507_v43 = vld [vmem:[%s648_s1 + $0x40] sm:$0xff]  ;;  %v516_v48 = vld [vmem:[%s648_s1 + $0x48] sm:$0xff] }
   0xc   :  { %v521_v49 = vld [vmem:[%s648_s1 + $0x50] sm:$0xff]  ;;  %v526_v50 = vld [vmem:[%s648_s1 + $0x58] sm:$0xff] }
   0xd   :  { %v535_v59 = vld [vmem:[%s648_s1 + $0x78] sm:$0xff] }
  0x12   :  { %141 = vperm.xlu2 %366, %v339_v7  }
  0x13   :  { %126 = vperm.xlu1 %365, %v338_v8   ;;  %115 = vperm.xlu0 %364, %v336_v9  }
  0x1a   :  { %187 = vperm.xlu2 %366, %v345_v10  }
  0x1b   :  { %178 = vperm.xlu1 %365, %v346_v11   ;;  %156 = vperm.xlu0 %364, %v340_v12  }
  0x22   :  { %259 = vperm.xlu2 %366, %v354_v13  }
  0x23   :  { %198 = vperm.xlu1 %365, %v347_v14   ;;  %250 = vperm.xlu0 %364, %v355_v15  }
  0x2a   :  { %285 = vperm.xlu2 %366, %v357_v16  }
  0x2b   :  { %213 = vperm.xlu1 %365, %v348_v17   ;;  %270 = vperm.xlu0 %364, %v356_v18  }
  0x33   :  { %300 = vperm.xlu1 %365, %v358_v19   ;;  %228 = vperm.xlu0 %364, %v349_v20  }
  0x5c   :  { %v86_v21 = vpop.permute.xlu2 %85 }
  0x5d   :  { %v88_v0 = vmul.f32 %v488_v34, %v86_v21  ;;  %v89_v1 = vmul.f32 %v497_v41, %v86_v21  ;;  %v90_v2 = vmul.f32 %v502_v42, %v86_v21  ;;  %v91_v7 = vmul.f32 %v535_v59, %v86_v21 }
  0x64   :  { %v107_v22 = vpop.permute.xlu2 %106 }
  0x65   :  { %v109_v9 = vmul.f32 %v107_v22, %v446_v25  ;;  %v110_v15 = vmul.f32 %v107_v22, %v451_v26  ;;  %v111_v16 = vmul.f32 %v107_v22, %v456_v27  ;;  %v112_v17 = vmul.f32 %v107_v22, %v461_v28 }
  0x6c   :  { %v463_v29 = vpop.permute.xlu2 %141 }
  0x74   :  { %v541_v8 = vpop.permute.xlu2 %187 }
  0x75   :  { %v56_v23 = vpop.permute.xlu1 %55  ;;  %v36_v24 = vpop.permute.xlu0 %35 }
  0x76   :  { %v38_v35 = vmul.f32 %v36_v24, %v446_v25  ;;  %v39_v36 = vmul.f32 %v36_v24, %v451_v26  ;;  %v40_v37 = vmul.f32 %v36_v24, %v456_v27  ;;  %v41_v38 = vmul.f32 %v36_v24, %v461_v28 }
  0x77   :  { %v58_v44 = vmul.f32 %v468_v30, %v56_v23  ;;  %v59_v45 = vmul.f32 %v473_v31, %v56_v23  ;;  %v60_v46 = vmul.f32 %v478_v32, %v56_v23  ;;  %v61_v47 = vmul.f32 %v483_v33, %v56_v23 }
  0x7d   :  { %v71_v39 = vpop.permute.xlu1 %70  ;;  %v45_v40 = vpop.permute.xlu0 %44 }
  0x7e   :  { %v47_v51 = vadd.f32 %v45_v40, %v38_v35  ;;  %v48_v52 = vadd.f32 %v45_v40, %v39_v36  ;;  %v49_v53 = vadd.f32 %v45_v40, %v40_v37  ;;  %v50_v54 = vadd.f32 %v45_v40, %v41_v38 }
  0x7f   :  { %v73_v55 = vmul.f32 %v507_v43, %v71_v39  ;;  %v74_v56 = vmul.f32 %v516_v48, %v71_v39  ;;  %v75_v57 = vmul.f32 %v521_v49, %v71_v39  ;;  %v76_v58 = vmul.f32 %v526_v50, %v71_v39 }
  0x80   :  { %v62_v60 = vadd.f32 %v58_v44, %v47_v51  ;;  %v63_v61 = vadd.f32 %v59_v45, %v48_v52  ;;  %v64_v62 = vadd.f32 %v60_v46, %v49_v53  ;;  %v65_v63 = vadd.f32 %v61_v47, %v50_v54 }
  0x81   :  { %v144_v40 = vmul.f32 %v507_v43, %v463_v29  ;;  %v145_v44 = vmul.f32 %v516_v48, %v463_v29  ;;  %v146_v45 = vmul.f32 %v521_v49, %v463_v29  ;;  %v147_v52 = vmul.f32 %v526_v50, %v463_v29 }
  0x82   :  { %v77_v3 = vadd.f32 %v73_v55, %v62_v60  ;;  %v78_v4 = vadd.f32 %v74_v56, %v63_v61  ;;  %v79_v5 = vadd.f32 %v75_v57, %v64_v62  ;;  %v80_v6 = vadd.f32 %v76_v58, %v65_v63  ;;  %v260_v56 = vpop.permute.xlu2 %259 }
  0x84   :  { %v92_v10 = vadd.f32 %v88_v0, %v77_v3  ;;  %v93_v11 = vadd.f32 %v89_v1, %v78_v4  ;;  %v94_v12 = vadd.f32 %v90_v2, %v79_v5  ;;  %v95_v18 = vadd.f32 %v91_v7, %v80_v6 }
  0x85   :  { %v127_v13 = vpop.permute.xlu1 %126  ;;  %v116_v14 = vpop.permute.xlu0 %115 }
  0x86   :  { %96 = vst [vmem:[%s649_s2] sm:$0xff] %v92_v10  ;;  %v129_v19 = vmul.f32 %v468_v30, %v127_v13  ;;  %v130_v20 = vmul.f32 %v473_v31, %v127_v13  ;;  %v131_v21 = vmul.f32 %v478_v32, %v127_v13  ;;  %v132_v23 = vmul.f32 %v483_v33, %v127_v13 }
  0x87   :  { %97 = vst [vmem:[%s649_s2 + $0x8] sm:$0xff] %v93_v11  ;;  %v118_v24 = vadd.f32 %v116_v14, %v109_v9  ;;  %v119_v35 = vadd.f32 %v116_v14, %v110_v15  ;;  %v120_v22 = vadd.f32 %v116_v14, %v111_v16  ;;  %v121_v36 = vadd.f32 %v116_v14, %v112_v17 }
  0x88   :  { %98 = vst [vmem:[%s649_s2 + $0x10] sm:$0xff] %v94_v12 }
  0x89   :  { %99 = vst [vmem:[%s649_s2 + $0x18] sm:$0xff] %v95_v18  ;;  %v133_v37 = vadd.f32 %v129_v19, %v118_v24  ;;  %v134_v38 = vadd.f32 %v130_v20, %v119_v35  ;;  %v135_v39 = vadd.f32 %v131_v21, %v120_v22  ;;  %v136_v46 = vadd.f32 %v132_v23, %v121_v36 }
  0x8a   :  { %v286_v4 = vpop.permute.xlu2 %285 }
  0x8b   :  { %v148_v53 = vadd.f32 %v144_v40, %v133_v37  ;;  %v149_v54 = vadd.f32 %v145_v44, %v134_v38  ;;  %v150_v55 = vadd.f32 %v146_v45, %v135_v39  ;;  %v151_v62 = vadd.f32 %v147_v52, %v136_v46 }
  0x8c   :  { %v288_v9 = vmul.f32 %v507_v43, %v286_v4  ;;  %v289_v10 = vmul.f32 %v516_v48, %v286_v4 }
  0x8d   :  { %v179_v47 = vpop.permute.xlu1 %178  ;;  %v157_v51 = vpop.permute.xlu0 %156 }
  0x8e   :  { %v159_v57 = vmul.f32 %v488_v34, %v157_v51  ;;  %v160_v58 = vmul.f32 %v497_v41, %v157_v51  ;;  %v161_v60 = vmul.f32 %v502_v42, %v157_v51  ;;  %v162_v61 = vmul.f32 %v535_v59, %v157_v51 }
  0x8f   :  { %v181_v11 = vmul.f32 %v179_v47, %v446_v25  ;;  %v182_v12 = vmul.f32 %v179_v47, %v451_v26  ;;  %v183_v13 = vmul.f32 %v179_v47, %v456_v27  ;;  %v184_v14 = vmul.f32 %v179_v47, %v461_v28 }
  0x90   :  { %v163_v63 = vadd.f32 %v159_v57, %v148_v53  ;;  %v164_v0 = vadd.f32 %v160_v58, %v149_v54  ;;  %v165_v1 = vadd.f32 %v161_v60, %v150_v55  ;;  %v166_v2 = vadd.f32 %v162_v61, %v151_v62 }
  0x91   :  { %v190_v35 = vadd.f32 %v541_v8, %v181_v11  ;;  %v191_v40 = vadd.f32 %v541_v8, %v182_v12  ;;  %v192_v44 = vadd.f32 %v541_v8, %v183_v13  ;;  %v193_v45 = vadd.f32 %v541_v8, %v184_v14 }
  0x92   :  { %341 = vst [vmem:[%s649_s2 + $0x20] sm:$0xff] %v163_v63 }
  0x93   :  { %342 = vst [vmem:[%s649_s2 + $0x28] sm:$0xff] %v164_v0 }
  0x94   :  { %343 = vst [vmem:[%s649_s2 + $0x30] sm:$0xff] %v165_v1 }
  0x95   :  { %v199_v29 = vpop.permute.xlu1 %198  ;;  %v251_v3 = vpop.permute.xlu0 %250  ;;  %344 = vst [vmem:[%s649_s2 + $0x38] sm:$0xff] %v166_v2 }
  0x96   :  { %v253_v5 = vmul.f32 %v251_v3, %v446_v25  ;;  %v254_v6 = vmul.f32 %v251_v3, %v451_v26  ;;  %v255_v7 = vmul.f32 %v251_v3, %v456_v27  ;;  %v256_v15 = vmul.f32 %v251_v3, %v461_v28 }
  0x97   :  { %v201_v18 = vmul.f32 %v468_v30, %v199_v29  ;;  %v290_v27 = vmul.f32 %v521_v49, %v286_v4  ;;  %v202_v28 = vmul.f32 %v473_v31, %v199_v29  ;;  %v203_v22 = vmul.f32 %v478_v32, %v199_v29 }
  0x98   :  { %v262_v19 = vadd.f32 %v260_v56, %v253_v5  ;;  %v263_v20 = vadd.f32 %v260_v56, %v254_v6  ;;  %v264_v21 = vadd.f32 %v260_v56, %v255_v7  ;;  %v265_v36 = vadd.f32 %v260_v56, %v256_v15 }
  0x99   :  { %v204_v46 = vmul.f32 %v483_v33, %v199_v29  ;;  %v205_v47 = vadd.f32 %v201_v18, %v190_v35  ;;  %v206_v52 = vadd.f32 %v202_v28, %v191_v40 }
  0x9b   :  { %v208_v3 = vadd.f32 %v204_v46, %v193_v45 }
  0x9d   :  { %v214_v16 = vpop.permute.xlu1 %213  ;;  %v271_v17 = vpop.permute.xlu0 %270 }
  0x9e   :  { %v273_v23 = vmul.f32 %v468_v30, %v271_v17  ;;  %v274_v24 = vmul.f32 %v473_v31, %v271_v17  ;;  %v275_v25 = vmul.f32 %v478_v32, %v271_v17  ;;  %v276_v26 = vmul.f32 %v483_v33, %v271_v17 }
  0x9f   :  { %v291_v30 = vmul.f32 %v526_v50, %v286_v4  ;;  %v216_v51 = vmul.f32 %v507_v43, %v214_v16  ;;  %v207_v32 = vadd.f32 %v203_v22, %v192_v44  ;;  %v217_v53 = vmul.f32 %v516_v48, %v214_v16 }
  0xa0   :  { %v277_v37 = vadd.f32 %v273_v23, %v262_v19  ;;  %v278_v38 = vadd.f32 %v274_v24, %v263_v20  ;;  %v279_v39 = vadd.f32 %v275_v25, %v264_v21  ;;  %v280_v31 = vadd.f32 %v276_v26, %v265_v36 }
  0xa1   :  { %v218_v54 = vmul.f32 %v521_v49, %v214_v16  ;;  %v219_v55 = vmul.f32 %v526_v50, %v214_v16  ;;  %v220_v0 = vadd.f32 %v216_v51, %v205_v47  ;;  %v221_v5 = vadd.f32 %v217_v53, %v206_v52 }
  0xa2   :  { %v292_v57 = vadd.f32 %v288_v9, %v277_v37  ;;  %v293_v58 = vadd.f32 %v289_v10, %v278_v38  ;;  %v294_v60 = vadd.f32 %v290_v27, %v279_v39  ;;  %v295_v63 = vadd.f32 %v291_v30, %v280_v31 }
  0xa3   :  { %v222_v7 = vadd.f32 %v218_v54, %v207_v32 }
  0xa5   :  { %v301_v56 = vpop.permute.xlu1 %300  ;;  %v229_v61 = vpop.permute.xlu0 %228 }
  0xa6   :  { %v303_v8 = vmul.f32 %v488_v34, %v301_v56  ;;  %v304_v33 = vmul.f32 %v497_v41, %v301_v56  ;;  %v305_v43 = vmul.f32 %v502_v42, %v301_v56  ;;  %v306_v62 = vmul.f32 %v535_v59, %v301_v56 }
  0xa7   :  { %v231_v48 = vmul.f32 %v488_v34, %v229_v61  ;;  %v232_v49 = vmul.f32 %v497_v41, %v229_v61  ;;  %v233_v29 = vmul.f32 %v502_v42, %v229_v61  ;;  %v234_v6 = vmul.f32 %v535_v59, %v229_v61 }
  0xa8   :  { %v307_v50 = vadd.f32 %v303_v8, %v292_v57  ;;  %v308_v1 = vadd.f32 %v304_v33, %v293_v58  ;;  %v309_v2 = vadd.f32 %v305_v43, %v294_v60  ;;  %v310_v4 = vadd.f32 %v306_v62, %v295_v63 }
  0xa9   :  { %v235_v9 = vadd.f32 %v231_v48, %v220_v0  ;;  %v223_v34 = vadd.f32 %v219_v55, %v208_v3  ;;  %v236_v41 = vadd.f32 %v232_v49, %v221_v5  ;;  %v237_v42 = vadd.f32 %v233_v29, %v222_v7 }
  0xaa   :  { %359 = vst [vmem:[%s649_s2 + $0x60] sm:$0xff] %v307_v50 }
  0xab   :  { %360 = vst [vmem:[%s649_s2 + $0x68] sm:$0xff] %v308_v1  ;;  %v238_v59 = vadd.f32 %v234_v6, %v223_v34 }
  0xac   :  { %361 = vst [vmem:[%s649_s2 + $0x70] sm:$0xff] %v309_v2 }
  0xad   :  { %362 = vst [vmem:[%s649_s2 + $0x78] sm:$0xff] %v310_v4 }
  0xae   :  { %350 = vst [vmem:[%s649_s2 + $0x40] sm:$0xff] %v235_v9 }
  0xaf   :  { %351 = vst [vmem:[%s649_s2 + $0x48] sm:$0xff] %v236_v41 }
  0xb0   :  { %352 = vst [vmem:[%s649_s2 + $0x50] sm:$0xff] %v237_v42 }
  0xb1   :  { %353 = vst [vmem:[%s649_s2 + $0x58] sm:$0xff] %v238_v59 }

</bundles_post_ra>
